<compile_context>
chip_gen: v7x
topology: tpu7x:2x2x1
jax: 0.10.0
libtpu: 0.0.40
codegen_flags: <defaults>
</compile_context>

<pallas_src>
import functools

import jax
import jax.numpy as jnp
from jax import lax
from jax.experimental import pallas as pl
from jax.experimental.pallas import tpu as pltpu


def _leaky(z):
    # nn.LeakyReLU default negative_slope = 0.01
    return jnp.where(z >= 0, z, jnp.float32(0.01) * z)


def _layer_norm(z, g, b, eps=1e-5):
    mu = jnp.mean(z, axis=-1, keepdims=True)
    var = jnp.mean((z - mu) ** 2, axis=-1, keepdims=True)
    return (z - mu) * lax.rsqrt(var + eps) * g + b


def _recip(x):
    # EUP approx reciprocal (free slot); falls back to a VPU divide if unavailable.
    if hasattr(pl, "reciprocal"):
        return pl.reciprocal(x, approx=True)
    return 1.0 / x


@functools.lru_cache(maxsize=None)
def _batched_dot_general_supported():
    """Probe whether this Pallas/Mosaic build lowers a leading-batched
    dot_general (used to put the relative-position term on the MXU).
    Returns False -> kernel uses the proven VPU multiply + reduce fallback."""
    def k(a_ref, b_ref, o_ref):
        t = jnp.einsum("qud,qkd->quk", a_ref[...], b_ref[...],
                       preferred_element_type=jnp.float32)
        o_ref[...] = t.reshape(o_ref.shape)

    try:
        f = pl.pallas_call(
            k, out_shape=jax.ShapeDtypeStruct((8, 16), jnp.float32))
        jax.jit(f).lower(jnp.zeros((8, 1, 8), jnp.bfloat16),
                         jnp.zeros((8, 16, 8), jnp.bfloat16)).compile()
        return True
    except Exception:
        return False


# ----------------------------------------------------------------------------
# Pallas kernel: one CrossAttention layer, one (batch, query-tile) grid point.
# ----------------------------------------------------------------------------
def _cross_attn_kernel(nh, use_mxu_term2,
                       x_ref, y_ref, mask_ref, pe_ref, u_ref, vp_ref,
                       wq_ref, bq_ref, wv_ref, bv_ref, wkr_ref, bkr_ref,
                       wf_ref, bf_ref, g1_ref, be1_ref,
                       w1_ref, b1_ref, w2_ref, b2_ref, g2_ref, be2_ref,
                       out_ref):
    f32 = jnp.float32
    bf16 = jnp.bfloat16
    TQ, H = x_ref.shape
    L = y_ref.shape[0]
    hd = H // nh

    x = x_ref[...]                         # (TQ, H) f32 (kept f32 for residual)
    y_bf = y_ref[...]                      # (L, H)  bf16; k = y (K linear unused)
    pe_bf = pe_ref[...]                    # (TQ*L, H) bf16

    # --- projections: bf16 operands, f32 accumulation on the MXU -------------
    q = jnp.dot(x.astype(bf16), wq_ref[...],
                preferred_element_type=f32) + bq_ref[...]              # (TQ, H)
    v_bf = (jnp.dot(y_bf, wv_ref[...],
                    preferred_element_type=f32) + bv_ref[...]).astype(bf16)
    rk_bf = (jnp.dot(pe_bf, wkr_ref[...],
                     preferred_element_type=f32) + bkr_ref[...]).astype(bf16)

    # u / v params are shipped as (1, H) = per-head params concatenated along
    # the hidden dim, so adding them here is exactly the per-head (q_h + u_h).
    qu = (q + u_ref[...]).astype(bf16)     # (TQ, H)
    qv = (q + vp_ref[...]).astype(bf16)    # (TQ, H)

    # additive key-mask bias, hoisted out of the head loop (single broadcast)
    mask_bias = jnp.broadcast_to(
        jnp.where(mask_ref[...] > 0.5, f32(0.0), f32(-1e6)), (TQ, L))

    # ff_final is folded into the head loop: acc += (p_h @ v_h) @ wf_h, so all
    # accumulators / stores are lane-dense (TQ, H) slabs (no per-head scratch).
    acc = jnp.zeros((TQ, H), f32)
    # TODO(synk): for nh >> 4 switch this static unroll to lax.fori_loop to
    # bound vreg live ranges (nh=4 here, unrolling is fine).
    for h in range(nh):
        hs = h * hd
        qu_h = qu[:, hs:hs + hd]                         # (TQ, hd) bf16
        qv_h = qv[:, hs:hs + hd]                         # (TQ, hd) bf16
        k_h = y_bf[:, hs:hs + hd]                        # (L, hd)  bf16
        v_h = v_bf[:, hs:hs + hd]                        # (L, hd)  bf16
        rk_h = rk_bf[:, hs:hs + hd].reshape(TQ, L, hd)   # (TQ, L, hd) bf16

        # content term on the MXU: (q_h + u_h) @ k_h^T
        term1 = lax.dot_general(
            qu_h, k_h,
            dimension_numbers=(((1,), (1,)), ((), ())),
            preferred_element_type=f32)                  # (TQ, L)

        if use_mxu_term2:
            # position term as a query-batched matmul on the MXU
            t2 = jnp.einsum("qud,qkd->quk", qv_h[:, None, :], rk_h,
                            preferred_element_type=f32)  # (TQ, 1, L)
            term2 = t2.reshape(TQ, L)
        else:
            # fallback (older Mosaic): VPU multiply + reduce over head dim
            term2 = jnp.sum(
                qv_h.astype(f32)[:, None, :] * rk_h.astype(f32), axis=-1)

        attn = term1 + term2 + mask_bias
        attn = attn - jnp.max(attn, axis=-1, keepdims=True)
        e = jnp.exp(attn)
        p = e * _recip(jnp.sum(e, axis=-1, keepdims=True))   # softmax (EUP recip)

        o_h = jnp.dot(p.astype(bf16), v_h, preferred_element_type=f32)  # (TQ, hd)
        acc = acc + jnp.dot(o_h.astype(bf16), wf_ref[h],
                            preferred_element_type=f32)                 # (TQ, H)

    # ff_final bias + LeakyReLU + residual + norm1
    h0 = _leaky(acc + bf_ref[...]) + x
    h0 = _layer_norm(h0, g1_ref[...], be1_ref[...])

    # ff1 -> LeakyReLU -> ff2 + residual + norm2
    h1 = _leaky(jnp.dot(h0.astype(bf16), w1_ref[...],
                        preferred_element_type=f32) + b1_ref[...])
    h2 = jnp.dot(h1.astype(bf16), w2_ref[...],
                 preferred_element_type=f32) + b2_ref[...] + h0
    out_ref[...] = _layer_norm(h2, g2_ref[...], be2_ref[...])


# ----------------------------------------------------------------------------
# Wrapper for one CrossAttention layer (glue: dtype casts / reshapes only).
# ----------------------------------------------------------------------------
def cross_attention_layer(x, y, mask, pos_emb, p, *, q_tile=None):
    B, L, H = x.shape
    nh, hd = p["u"].shape
    assert H == nh * hd

    # Query-tile size: only tile when L is large enough for VMEM to matter.
    if q_tile is None:
        q_tile = L
        if L > 256:
            for cand in (256, 128, 64, 32, 16, 8):
                if L % cand == 0:
                    q_tile = cand
                    break
    TQ = q_tile
    assert L % TQ == 0 and (TQ == L or TQ % 8 == 0)
    nqt = L // TQ

    bf16, f32 = jnp.bfloat16, jnp.float32
    use_mxu_term2 = _batched_dot_general_supported()

    pe_flat = pos_emb.reshape(B, L * L, H).astype(bf16)
    mask_f = mask.astype(f32).reshape(B, 1, L)

    args = [
        x.astype(f32),
        y.astype(bf16),
        mask_f,
        pe_flat,
        p["u"].reshape(1, H).astype(f32),
        p["v"].reshape(1, H).astype(f32),
        p["wq"].T.astype(bf16), p["bq"].reshape(1, H).astype(f32),
        p["wv"].T.astype(bf16), p["bv"].reshape(1, H).astype(f32),
        p["wkr"].T.astype(bf16), p["bkr"].reshape(1, H).astype(f32),
        p["wf"].T.reshape(nh, hd, H).astype(bf16), p["bf"].reshape(1, H).astype(f32),
        p["g1"].reshape(1, H).astype(f32), p["be1"].reshape(1, H).astype(f32),
        p["w1"].T.astype(bf16), p["b1"].reshape(1, 3 * H).astype(f32),
        p["w2"].T.astype(bf16), p["b2"].reshape(1, H).astype(f32),
        p["g2"].reshape(1, H).astype(f32), p["be2"].reshape(1, H).astype(f32),
    ]

    def batched(shape, idx):
        return pl.BlockSpec((None,) + shape, idx)

    def full(shape):
        nd = len(shape)
        return pl.BlockSpec(shape, lambda b, qi, nd=nd: (0,) * nd)

    in_specs = (
        [
            batched((TQ, H), lambda b, qi: (b, qi, 0)),       # x: query tile
            batched((L, H), lambda b, qi: (b, 0, 0)),         # y: all keys
            batched((1, L), lambda b, qi: (b, 0, 0)),         # key mask
            batched((TQ * L, H), lambda b, qi: (b, qi, 0)),   # pos_emb rows of tile
        ]
        + [full(a.shape) for a in args[4:]]                   # params (loop-invariant)
    )
    # NOTE: on v7x (64 MiB VMEM) the loop-invariant param specs above could
    # additionally take pipeline_mode=pl.Buffered(1) to halve their footprint.

    kernel = functools.partial(_cross_attn_kernel, nh, use_mxu_term2)

    return pl.pallas_call(
        kernel,
        out_shape=jax.ShapeDtypeStruct((B, L, H), jnp.float32),
        grid=(B, nqt),
        in_specs=in_specs,
        out_specs=batched((TQ, H), lambda b, qi: (b, qi, 0)),
        compiler_params=pltpu.CompilerParams(
            dimension_semantics=("parallel", "parallel"),
            vmem_limit_bytes=48 * 1024 * 1024),
    )(*args)


def cross_attention_block(x, y, mask, pos_emb, layer_params, *, q_tile=None):
    # CrossAttention_Block: sequential stack, each layer updates x only.
    for p in layer_params:
        x = cross_attention_layer(x, y, mask, pos_emb, p, q_tile=q_tile)
    return x


# ----------------------------------------------------------------------------
# Deterministic parameter init (torch-Linear-like uniform), torch-style shapes.
# ----------------------------------------------------------------------------
def init_layer_params(key, H, nh):
    hd = H // nh
    ks = jax.random.split(key, 8)

    def lin(k, out_d, in_d):
        k1, k2 = jax.random.split(k)
        bound = 1.0 / (in_d ** 0.5)
        w = jax.random.uniform(k1, (out_d, in_d), jnp.float32, -bound, bound)
        b = jax.random.uniform(k2, (out_d,), jnp.float32, -bound, bound)
        return w, b

    wq, bq = lin(ks[0], H, H)
    wv, bv = lin(ks[1], H, H)
    wkr, bkr = lin(ks[2], H, H)
    wf, bf = lin(ks[3], H, H)
    w1, b1 = lin(ks[4], 3 * H, H)
    w2, b2 = lin(ks[5], H, 3 * H)
    u = 0.1 * jax.random.normal(ks[6], (nh, hd), jnp.float32)
    v = 0.1 * jax.random.normal(ks[7], (nh, hd), jnp.float32)
    return dict(
        wq=wq, bq=bq, wv=wv, bv=bv, wkr=wkr, bkr=bkr,
        wf=wf, bf=bf, w1=w1, b1=b1, w2=w2, b2=b2,
        u=u, v=v,
        g1=jnp.ones((H,), jnp.float32), be1=jnp.zeros((H,), jnp.float32),
        g2=jnp.ones((H,), jnp.float32), be2=jnp.zeros((H,), jnp.float32),
    )


# ----------------------------------------------------------------------------
# Pure-JAX reference (mirrors the PyTorch forward, eval mode) for verification.
# Uses HIGHEST matmul precision so it is a near-f32-exact baseline for the
# bf16-compute kernel.
# ----------------------------------------------------------------------------
_HI = jax.lax.Precision.HIGHEST


def _mm(a, b):
    return jnp.matmul(a, b, precision=_HI)


def ref_layer(x, y, mask, pos_emb, p):
    B, L, H = x.shape
    nh, hd = p["u"].shape

    def th(t):
        return t.reshape(B, L, nh, hd).transpose(0, 2, 1, 3)

    q = th(_mm(x, p["wq"].T) + p["bq"])
    k = th(y)
    v = th(_mm(y, p["wv"].T) + p["bv"])
    rk = _mm(pos_emb, p["wkr"].T) + p["bkr"]
    rk = rk.reshape(B, L, L, nh, hd).transpose(0, 3, 1, 4, 2)   # (B,nh,Lq,hd,Lk)
    u = p["u"][None, :, None, :]
    vp = p["v"][None, :, None, None, :]
    attn = _mm(q + u, jnp.swapaxes(k, -1, -2))
    attn = attn + _mm(q[..., None, :] + vp, rk)[..., 0, :]
    attn = jnp.where(mask[:, None, None, :], attn, -1e6)
    attn = jax.nn.softmax(attn, axis=-1)
    out = _mm(attn, v).transpose(0, 2, 1, 3).reshape(B, L, H)
    out = _leaky(_mm(out, p["wf"].T) + p["bf"]) + x
    out = _layer_norm(out, p["g1"], p["be1"])
    x_ = out
    out = _mm(_leaky(_mm(out, p["w1"].T) + p["b1"]), p["w2"].T) + p["b2"]
    out = out + x_
    return _layer_norm(out, p["g2"], p["be2"])


def ref_block(x, y, mask, pos_emb, layer_params):
    for p in layer_params:
        x = ref_layer(x, y, mask, pos_emb, p)
    return x


if __name__ == "__main__":
    B, L, H, nh, layers = 2, 8, 32, 4, 2

    key = jax.random.PRNGKey(0)
    kx, ky, kp, kpar = jax.random.split(key, 4)
    x = jax.random.normal(kx, (B, L, H), jnp.float32)
    y = jax.random.normal(ky, (B, L, H), jnp.float32)
    pos_emb = jax.random.normal(kp, (B, L, L, H), jnp.float32)
    lens = jnp.array([L, L - 2])
    mask = jnp.arange(L)[None, :] < lens[:, None]          # (B, L) bool key mask

    layer_params = [init_layer_params(k, H, nh)
                    for k in jax.random.split(kpar, layers)]

    out = cross_attention_block(x, y, mask, pos_emb, layer_params)
    out = jax.block_until_ready(out)

    ref = ref_block(x, y, mask, pos_emb, layer_params)
    assert out.shape == (B, L, H)
    assert bool(jnp.all(jnp.isfinite(out)))
    # bf16 compute (f32 accumulation) vs near-exact f32 reference.
    assert bool(jnp.max(jnp.abs(out - ref)) < 1e-1)

    print("KERNEL_OK")
</pallas_src>

<mosaic_0001>
module attributes {stable_mosaic.version = 11 : i64} {
  func.func @_cross_attn_kernel(%arg0: i32, %arg1: i32, %arg2: memref<1x8x32xf32, #tpu.memory_space<vmem>>, %arg3: memref<1x8x32xbf16, #tpu.memory_space<vmem>>, %arg4: memref<1x1x8xf32, #tpu.memory_space<vmem>>, %arg5: memref<1x64x32xbf16, #tpu.memory_space<vmem>>, %arg6: memref<1x32xf32, #tpu.memory_space<vmem>>, %arg7: memref<1x32xf32, #tpu.memory_space<vmem>>, %arg8: memref<32x32xbf16, #tpu.memory_space<vmem>>, %arg9: memref<1x32xf32, #tpu.memory_space<vmem>>, %arg10: memref<32x32xbf16, #tpu.memory_space<vmem>>, %arg11: memref<1x32xf32, #tpu.memory_space<vmem>>, %arg12: memref<32x32xbf16, #tpu.memory_space<vmem>>, %arg13: memref<1x32xf32, #tpu.memory_space<vmem>>, %arg14: memref<4x8x32xbf16, #tpu.memory_space<vmem>>, %arg15: memref<1x32xf32, #tpu.memory_space<vmem>>, %arg16: memref<1x32xf32, #tpu.memory_space<vmem>>, %arg17: memref<1x32xf32, #tpu.memory_space<vmem>>, %arg18: memref<32x96xbf16, #tpu.memory_space<vmem>>, %arg19: memref<1x96xf32, #tpu.memory_space<vmem>>, %arg20: memref<96x32xbf16, #tpu.memory_space<vmem>>, %arg21: memref<1x32xf32, #tpu.memory_space<vmem>>, %arg22: memref<1x32xf32, #tpu.memory_space<vmem>>, %arg23: memref<1x32xf32, #tpu.memory_space<vmem>>, %arg24: memref<1x8x32xf32, #tpu.memory_space<vmem>>) attributes {dimension_semantics = [#tpu.dimension_semantics<parallel>, #tpu.dimension_semantics<parallel>], iteration_bounds = array<i64: 2, 1>, scalar_prefetch = 0 : i64, scratch_operands = 0 : i64, tpu.core_type = #tpu.core_type<tc>, window_params = [{transform_indices = @transform_0, window_bounds = array<i64: 1, 8, 32>}, {transform_indices = @transform_1, window_bounds = array<i64: 1, 8, 32>}, {transform_indices = @transform_2, window_bounds = array<i64: 1, 1, 8>}, {transform_indices = @transform_3, window_bounds = array<i64: 1, 64, 32>}, {pipeline_mode = #tpu.pipeline_mode<synchronous>, transform_indices = @transform_4, window_bounds = array<i64: 1, 32>}, {pipeline_mode = #tpu.pipeline_mode<synchronous>, transform_indices = @transform_5, window_bounds = array<i64: 1, 32>}, {pipeline_mode = #tpu.pipeline_mode<synchronous>, transform_indices = @transform_6, window_bounds = array<i64: 32, 32>}, {pipeline_mode = #tpu.pipeline_mode<synchronous>, transform_indices = @transform_7, window_bounds = array<i64: 1, 32>}, {pipeline_mode = #tpu.pipeline_mode<synchronous>, transform_indices = @transform_8, window_bounds = array<i64: 32, 32>}, {pipeline_mode = #tpu.pipeline_mode<synchronous>, transform_indices = @transform_9, window_bounds = array<i64: 1, 32>}, {pipeline_mode = #tpu.pipeline_mode<synchronous>, transform_indices = @transform_10, window_bounds = array<i64: 32, 32>}, {pipeline_mode = #tpu.pipeline_mode<synchronous>, transform_indices = @transform_11, window_bounds = array<i64: 1, 32>}, {pipeline_mode = #tpu.pipeline_mode<synchronous>, transform_indices = @transform_12, window_bounds = array<i64: 4, 8, 32>}, {pipeline_mode = #tpu.pipeline_mode<synchronous>, transform_indices = @transform_13, window_bounds = array<i64: 1, 32>}, {pipeline_mode = #tpu.pipeline_mode<synchronous>, transform_indices = @transform_14, window_bounds = array<i64: 1, 32>}, {pipeline_mode = #tpu.pipeline_mode<synchronous>, transform_indices = @transform_15, window_bounds = array<i64: 1, 32>}, {pipeline_mode = #tpu.pipeline_mode<synchronous>, transform_indices = @transform_16, window_bounds = array<i64: 32, 96>}, {pipeline_mode = #tpu.pipeline_mode<synchronous>, transform_indices = @transform_17, window_bounds = array<i64: 1, 96>}, {pipeline_mode = #tpu.pipeline_mode<synchronous>, transform_indices = @transform_18, window_bounds = array<i64: 96, 32>}, {pipeline_mode = #tpu.pipeline_mode<synchronous>, transform_indices = @transform_19, window_bounds = array<i64: 1, 32>}, {pipeline_mode = #tpu.pipeline_mode<synchronous>, transform_indices = @transform_20, window_bounds = array<i64: 1, 32>}, {pipeline_mode = #tpu.pipeline_mode<synchronous>, transform_indices = @transform_21, window_bounds = array<i64: 1, 32>}, {transform_indices = @transform_22, window_bounds = array<i64: 1, 8, 32>}]} {
    %c0 = arith.constant 0 : index
    %c0_0 = arith.constant 0 : index
    %c0_1 = arith.constant 0 : index
    %0 = vector.load %arg2[%c0, %c0_0, %c0_1] : memref<1x8x32xf32, #tpu.memory_space<vmem>>, vector<1x8x32xf32>
    %1 = vector.shape_cast %0 : vector<1x8x32xf32> to vector<8x32xf32>
    %c0_2 = arith.constant 0 : index
    %c0_3 = arith.constant 0 : index
    %c0_4 = arith.constant 0 : index
    %2 = vector.load %arg3[%c0_2, %c0_3, %c0_4] : memref<1x8x32xbf16, #tpu.memory_space<vmem>>, vector<1x8x32xbf16>
    %3 = vector.shape_cast %2 : vector<1x8x32xbf16> to vector<8x32xbf16>
    %c0_5 = arith.constant 0 : index
    %c0_6 = arith.constant 0 : index
    %c0_7 = arith.constant 0 : index
    %4 = vector.load %arg5[%c0_5, %c0_6, %c0_7] : memref<1x64x32xbf16, #tpu.memory_space<vmem>>, vector<1x64x32xbf16>
    %5 = vector.shape_cast %4 : vector<1x64x32xbf16> to vector<64x32xbf16>
    %6 = arith.truncf %1 : vector<8x32xf32> to vector<8x32xbf16>
    %c0_8 = arith.constant 0 : index
    %c0_9 = arith.constant 0 : index
    %7 = vector.load %arg8[%c0_8, %c0_9] : memref<32x32xbf16, #tpu.memory_space<vmem>>, vector<32x32xbf16>
    %cst = arith.constant dense<0.000000e+00> : vector<8x32xf32>
    %8 = tpu.matmul %6, %7, %cst {dimension_numbers = #tpu.dot_dimension_numbers<[1], [0], [0], [1], [0, 0, 1, 1], [], []>} : vector<8x32xbf16>, vector<32x32xbf16>, vector<8x32xf32> -> vector<8x32xf32>
    %c0_10 = arith.constant 0 : index
    %c0_11 = arith.constant 0 : index
    %9 = vector.load %arg9[%c0_10, %c0_11] : memref<1x32xf32, #tpu.memory_space<vmem>>, vector<1x32xf32>
    %10 = vector.broadcast %9 : vector<1x32xf32> to vector<8x32xf32>
    %11 = arith.addf %8, %10 : vector<8x32xf32>
    %c0_12 = arith.constant 0 : index
    %c0_13 = arith.constant 0 : index
    %12 = vector.load %arg10[%c0_12, %c0_13] : memref<32x32xbf16, #tpu.memory_space<vmem>>, vector<32x32xbf16>
    %cst_14 = arith.constant dense<0.000000e+00> : vector<8x32xf32>
    %13 = tpu.matmul %3, %12, %cst_14 {dimension_numbers = #tpu.dot_dimension_numbers<[1], [0], [0], [1], [0, 0, 1, 1], [], []>} : vector<8x32xbf16>, vector<32x32xbf16>, vector<8x32xf32> -> vector<8x32xf32>
    %c0_15 = arith.constant 0 : index
    %c0_16 = arith.constant 0 : index
    %14 = vector.load %arg11[%c0_15, %c0_16] : memref<1x32xf32, #tpu.memory_space<vmem>>, vector<1x32xf32>
    %15 = vector.broadcast %14 : vector<1x32xf32> to vector<8x32xf32>
    %16 = arith.addf %13, %15 : vector<8x32xf32>
    %17 = arith.truncf %16 : vector<8x32xf32> to vector<8x32xbf16>
    %c0_17 = arith.constant 0 : index
    %c0_18 = arith.constant 0 : index
    %18 = vector.load %arg12[%c0_17, %c0_18] : memref<32x32xbf16, #tpu.memory_space<vmem>>, vector<32x32xbf16>
    %cst_19 = arith.constant dense<0.000000e+00> : vector<64x32xf32>
    %19 = tpu.matmul %5, %18, %cst_19 {dimension_numbers = #tpu.dot_dimension_numbers<[1], [0], [0], [1], [0, 0, 1, 1], [], []>} : vector<64x32xbf16>, vector<32x32xbf16>, vector<64x32xf32> -> vector<64x32xf32>
    %c0_20 = arith.constant 0 : index
    %c0_21 = arith.constant 0 : index
    %20 = vector.load %arg13[%c0_20, %c0_21] : memref<1x32xf32, #tpu.memory_space<vmem>>, vector<1x32xf32>
    %21 = vector.broadcast %20 : vector<1x32xf32> to vector<64x32xf32>
    %22 = arith.addf %19, %21 : vector<64x32xf32>
    %23 = arith.truncf %22 : vector<64x32xf32> to vector<64x32xbf16>
    %c0_22 = arith.constant 0 : index
    %c0_23 = arith.constant 0 : index
    %24 = vector.load %arg6[%c0_22, %c0_23] : memref<1x32xf32, #tpu.memory_space<vmem>>, vector<1x32xf32>
    %25 = vector.broadcast %24 : vector<1x32xf32> to vector<8x32xf32>
    %26 = arith.addf %11, %25 : vector<8x32xf32>
    %27 = arith.truncf %26 : vector<8x32xf32> to vector<8x32xbf16>
    %c0_24 = arith.constant 0 : index
    %c0_25 = arith.constant 0 : index
    %28 = vector.load %arg7[%c0_24, %c0_25] : memref<1x32xf32, #tpu.memory_space<vmem>>, vector<1x32xf32>
    %29 = vector.broadcast %28 : vector<1x32xf32> to vector<8x32xf32>
    %30 = arith.addf %11, %29 : vector<8x32xf32>
    %31 = arith.truncf %30 : vector<8x32xf32> to vector<8x32xbf16>
    %c0_26 = arith.constant 0 : index
    %c0_27 = arith.constant 0 : index
    %c0_28 = arith.constant 0 : index
    %32 = vector.load %arg4[%c0_26, %c0_27, %c0_28] : memref<1x1x8xf32, #tpu.memory_space<vmem>>, vector<1x1x8xf32>
    %33 = vector.shape_cast %32 : vector<1x1x8xf32> to vector<1x8xf32>
    %cst_29 = arith.constant 5.000000e-01 : f32
    %34 = vector.broadcast %cst_29 : f32 to vector<1x8xf32>
    %35 = arith.cmpf ogt, %33, %34 : vector<1x8xf32>
    %cst_30 = arith.constant 0.000000e+00 : f32
    %cst_31 = arith.constant -1.000000e+06 : f32
    %36 = vector.broadcast %cst_30 : f32 to vector<1x8xf32>
    %37 = vector.broadcast %cst_31 : f32 to vector<1x8xf32>
    %38 = arith.select %35, %36, %37 : vector<1x8xi1>, vector<1x8xf32>
    %39 = vector.shape_cast %38 : vector<1x8xf32> to vector<1x8xf32>
    %40 = vector.broadcast %39 : vector<1x8xf32> to vector<8x8xf32>
    %cst_32 = arith.constant 0.000000e+00 : f32
    %41 = vector.broadcast %cst_32 : f32 to vector<8x32xf32>
    %42 = vector.extract_strided_slice %27 {offsets = [0, 0], sizes = [8, 8], strides = [1, 1]} : vector<8x32xbf16> to vector<8x8xbf16>
    %43 = vector.extract_strided_slice %31 {offsets = [0, 0], sizes = [8, 8], strides = [1, 1]} : vector<8x32xbf16> to vector<8x8xbf16>
    %44 = vector.extract_strided_slice %3 {offsets = [0, 0], sizes = [8, 8], strides = [1, 1]} : vector<8x32xbf16> to vector<8x8xbf16>
    %45 = vector.extract_strided_slice %17 {offsets = [0, 0], sizes = [8, 8], strides = [1, 1]} : vector<8x32xbf16> to vector<8x8xbf16>
    %46 = vector.extract_strided_slice %23 {offsets = [0, 0], sizes = [64, 8], strides = [1, 1]} : vector<64x32xbf16> to vector<64x8xbf16>
    %47 = vector.shape_cast %46 : vector<64x8xbf16> to vector<8x8x8xbf16>
    %cst_33 = arith.constant dense<0.000000e+00> : vector<8x8xf32>
    %48 = tpu.matmul %42, %44, %cst_33 {dimension_numbers = #tpu.dot_dimension_numbers<[1], [1], [0], [0], [0, 0, 1, 0], [], []>} : vector<8x8xbf16>, vector<8x8xbf16>, vector<8x8xf32> -> vector<8x8xf32>
    %49 = arith.extf %43 : vector<8x8xbf16> to vector<8x8xf32>
    %50 = vector.shape_cast %49 : vector<8x8xf32> to vector<8x1x8xf32>
    %51 = arith.extf %47 : vector<8x8x8xbf16> to vector<8x8x8xf32>
    %52 = vector.broadcast %50 : vector<8x1x8xf32> to vector<8x8x8xf32>
    %53 = arith.mulf %52, %51 : vector<8x8x8xf32>
    %cst_34 = arith.constant dense<0.000000e+00> : vector<8x8xf32>
    %54 = vector.multi_reduction <add>, %53, %cst_34 [2] : vector<8x8x8xf32> to vector<8x8xf32>
    %55 = arith.addf %48, %54 : vector<8x8xf32>
    %56 = arith.addf %55, %40 : vector<8x8xf32>
    %cst_35 = arith.constant dense<0xFF800000> : vector<8xf32>
    %57 = vector.multi_reduction <maximumf>, %56, %cst_35 [1] : vector<8x8xf32> to vector<8xf32>
    %58 = vector.shape_cast %57 : vector<8xf32> to vector<8x1xf32>
    %59 = vector.broadcast %58 : vector<8x1xf32> to vector<8x8xf32>
    %60 = arith.subf %56, %59 : vector<8x8xf32>
    %61 = math.exp %60 : vector<8x8xf32>
    %cst_36 = arith.constant dense<0.000000e+00> : vector<8xf32>
    %62 = vector.multi_reduction <add>, %61, %cst_36 [1] : vector<8x8xf32> to vector<8xf32>
    %63 = vector.shape_cast %62 : vector<8xf32> to vector<8x1xf32>
    %64 = tpu.reciprocal %63 {approx = true} : vector<8x1xf32> -> vector<8x1xf32>
    %65 = vector.broadcast %64 : vector<8x1xf32> to vector<8x8xf32>
    %66 = arith.mulf %61, %65 : vector<8x8xf32>
    %67 = arith.truncf %66 : vector<8x8xf32> to vector<8x8xbf16>
    %cst_37 = arith.constant dense<0.000000e+00> : vector<8x8xf32>
    %68 = tpu.matmul %67, %45, %cst_37 {dimension_numbers = #tpu.dot_dimension_numbers<[1], [0], [0], [1], [0, 0, 1, 1], [], []>} : vector<8x8xbf16>, vector<8x8xbf16>, vector<8x8xf32> -> vector<8x8xf32>
    %69 = arith.truncf %68 : vector<8x8xf32> to vector<8x8xbf16>
    %c0_38 = arith.constant 0 : index
    %c0_39 = arith.constant 0 : index
    %c0_40 = arith.constant 0 : index
    %70 = vector.load %arg14[%c0_38, %c0_39, %c0_40] : memref<4x8x32xbf16, #tpu.memory_space<vmem>>, vector<1x8x32xbf16>
    %71 = vector.shape_cast %70 : vector<1x8x32xbf16> to vector<8x32xbf16>
    %cst_41 = arith.constant dense<0.000000e+00> : vector<8x32xf32>
    %72 = tpu.matmul %69, %71, %cst_41 {dimension_numbers = #tpu.dot_dimension_numbers<[1], [0], [0], [1], [0, 0, 1, 1], [], []>} : vector<8x8xbf16>, vector<8x32xbf16>, vector<8x32xf32> -> vector<8x32xf32>
    %73 = arith.addf %41, %72 : vector<8x32xf32>
    %74 = vector.extract_strided_slice %27 {offsets = [0, 8], sizes = [8, 8], strides = [1, 1]} : vector<8x32xbf16> to vector<8x8xbf16>
    %75 = vector.extract_strided_slice %31 {offsets = [0, 8], sizes = [8, 8], strides = [1, 1]} : vector<8x32xbf16> to vector<8x8xbf16>
    %76 = vector.extract_strided_slice %3 {offsets = [0, 8], sizes = [8, 8], strides = [1, 1]} : vector<8x32xbf16> to vector<8x8xbf16>
    %77 = vector.extract_strided_slice %17 {offsets = [0, 8], sizes = [8, 8], strides = [1, 1]} : vector<8x32xbf16> to vector<8x8xbf16>
    %78 = vector.extract_strided_slice %23 {offsets = [0, 8], sizes = [64, 8], strides = [1, 1]} : vector<64x32xbf16> to vector<64x8xbf16>
    %79 = vector.shape_cast %78 : vector<64x8xbf16> to vector<8x8x8xbf16>
    %cst_42 = arith.constant dense<0.000000e+00> : vector<8x8xf32>
    %80 = tpu.matmul %74, %76, %cst_42 {dimension_numbers = #tpu.dot_dimension_numbers<[1], [1], [0], [0], [0, 0, 1, 0], [], []>} : vector<8x8xbf16>, vector<8x8xbf16>, vector<8x8xf32> -> vector<8x8xf32>
    %81 = arith.extf %75 : vector<8x8xbf16> to vector<8x8xf32>
    %82 = vector.shape_cast %81 : vector<8x8xf32> to vector<8x1x8xf32>
    %83 = arith.extf %79 : vector<8x8x8xbf16> to vector<8x8x8xf32>
    %84 = vector.broadcast %82 : vector<8x1x8xf32> to vector<8x8x8xf32>
    %85 = arith.mulf %84, %83 : vector<8x8x8xf32>
    %cst_43 = arith.constant dense<0.000000e+00> : vector<8x8xf32>
    %86 = vector.multi_reduction <add>, %85, %cst_43 [2] : vector<8x8x8xf32> to vector<8x8xf32>
    %87 = arith.addf %80, %86 : vector<8x8xf32>
    %88 = arith.addf %87, %40 : vector<8x8xf32>
    %cst_44 = arith.constant dense<0xFF800000> : vector<8xf32>
    %89 = vector.multi_reduction <maximumf>, %88, %cst_44 [1] : vector<8x8xf32> to vector<8xf32>
    %90 = vector.shape_cast %89 : vector<8xf32> to vector<8x1xf32>
    %91 = vector.broadcast %90 : vector<8x1xf32> to vector<8x8xf32>
    %92 = arith.subf %88, %91 : vector<8x8xf32>
    %93 = math.exp %92 : vector<8x8xf32>
    %cst_45 = arith.constant dense<0.000000e+00> : vector<8xf32>
    %94 = vector.multi_reduction <add>, %93, %cst_45 [1] : vector<8x8xf32> to vector<8xf32>
    %95 = vector.shape_cast %94 : vector<8xf32> to vector<8x1xf32>
    %96 = tpu.reciprocal %95 {approx = true} : vector<8x1xf32> -> vector<8x1xf32>
    %97 = vector.broadcast %96 : vector<8x1xf32> to vector<8x8xf32>
    %98 = arith.mulf %93, %97 : vector<8x8xf32>
    %99 = arith.truncf %98 : vector<8x8xf32> to vector<8x8xbf16>
    %cst_46 = arith.constant dense<0.000000e+00> : vector<8x8xf32>
    %100 = tpu.matmul %99, %77, %cst_46 {dimension_numbers = #tpu.dot_dimension_numbers<[1], [0], [0], [1], [0, 0, 1, 1], [], []>} : vector<8x8xbf16>, vector<8x8xbf16>, vector<8x8xf32> -> vector<8x8xf32>
    %101 = arith.truncf %100 : vector<8x8xf32> to vector<8x8xbf16>
    %c1 = arith.constant 1 : index
    %c0_47 = arith.constant 0 : index
    %c0_48 = arith.constant 0 : index
    %102 = vector.load %arg14[%c1, %c0_47, %c0_48] : memref<4x8x32xbf16, #tpu.memory_space<vmem>>, vector<1x8x32xbf16>
    %103 = vector.shape_cast %102 : vector<1x8x32xbf16> to vector<8x32xbf16>
    %cst_49 = arith.constant dense<0.000000e+00> : vector<8x32xf32>
    %104 = tpu.matmul %101, %103, %cst_49 {dimension_numbers = #tpu.dot_dimension_numbers<[1], [0], [0], [1], [0, 0, 1, 1], [], []>} : vector<8x8xbf16>, vector<8x32xbf16>, vector<8x32xf32> -> vector<8x32xf32>
    %105 = arith.addf %73, %104 : vector<8x32xf32>
    %106 = vector.extract_strided_slice %27 {offsets = [0, 16], sizes = [8, 8], strides = [1, 1]} : vector<8x32xbf16> to vector<8x8xbf16>
    %107 = vector.extract_strided_slice %31 {offsets = [0, 16], sizes = [8, 8], strides = [1, 1]} : vector<8x32xbf16> to vector<8x8xbf16>
    %108 = vector.extract_strided_slice %3 {offsets = [0, 16], sizes = [8, 8], strides = [1, 1]} : vector<8x32xbf16> to vector<8x8xbf16>
    %109 = vector.extract_strided_slice %17 {offsets = [0, 16], sizes = [8, 8], strides = [1, 1]} : vector<8x32xbf16> to vector<8x8xbf16>
    %110 = vector.extract_strided_slice %23 {offsets = [0, 16], sizes = [64, 8], strides = [1, 1]} : vector<64x32xbf16> to vector<64x8xbf16>
    %111 = vector.shape_cast %110 : vector<64x8xbf16> to vector<8x8x8xbf16>
    %cst_50 = arith.constant dense<0.000000e+00> : vector<8x8xf32>
    %112 = tpu.matmul %106, %108, %cst_50 {dimension_numbers = #tpu.dot_dimension_numbers<[1], [1], [0], [0], [0, 0, 1, 0], [], []>} : vector<8x8xbf16>, vector<8x8xbf16>, vector<8x8xf32> -> vector<8x8xf32>
    %113 = arith.extf %107 : vector<8x8xbf16> to vector<8x8xf32>
    %114 = vector.shape_cast %113 : vector<8x8xf32> to vector<8x1x8xf32>
    %115 = arith.extf %111 : vector<8x8x8xbf16> to vector<8x8x8xf32>
    %116 = vector.broadcast %114 : vector<8x1x8xf32> to vector<8x8x8xf32>
    %117 = arith.mulf %116, %115 : vector<8x8x8xf32>
    %cst_51 = arith.constant dense<0.000000e+00> : vector<8x8xf32>
    %118 = vector.multi_reduction <add>, %117, %cst_51 [2] : vector<8x8x8xf32> to vector<8x8xf32>
    %119 = arith.addf %112, %118 : vector<8x8xf32>
    %120 = arith.addf %119, %40 : vector<8x8xf32>
    %cst_52 = arith.constant dense<0xFF800000> : vector<8xf32>
    %121 = vector.multi_reduction <maximumf>, %120, %cst_52 [1] : vector<8x8xf32> to vector<8xf32>
    %122 = vector.shape_cast %121 : vector<8xf32> to vector<8x1xf32>
    %123 = vector.broadcast %122 : vector<8x1xf32> to vector<8x8xf32>
    %124 = arith.subf %120, %123 : vector<8x8xf32>
    %125 = math.exp %124 : vector<8x8xf32>
    %cst_53 = arith.constant dense<0.000000e+00> : vector<8xf32>
    %126 = vector.multi_reduction <add>, %125, %cst_53 [1] : vector<8x8xf32> to vector<8xf32>
    %127 = vector.shape_cast %126 : vector<8xf32> to vector<8x1xf32>
    %128 = tpu.reciprocal %127 {approx = true} : vector<8x1xf32> -> vector<8x1xf32>
    %129 = vector.broadcast %128 : vector<8x1xf32> to vector<8x8xf32>
    %130 = arith.mulf %125, %129 : vector<8x8xf32>
    %131 = arith.truncf %130 : vector<8x8xf32> to vector<8x8xbf16>
    %cst_54 = arith.constant dense<0.000000e+00> : vector<8x8xf32>
    %132 = tpu.matmul %131, %109, %cst_54 {dimension_numbers = #tpu.dot_dimension_numbers<[1], [0], [0], [1], [0, 0, 1, 1], [], []>} : vector<8x8xbf16>, vector<8x8xbf16>, vector<8x8xf32> -> vector<8x8xf32>
    %133 = arith.truncf %132 : vector<8x8xf32> to vector<8x8xbf16>
    %c2 = arith.constant 2 : index
    %c0_55 = arith.constant 0 : index
    %c0_56 = arith.constant 0 : index
    %134 = vector.load %arg14[%c2, %c0_55, %c0_56] : memref<4x8x32xbf16, #tpu.memory_space<vmem>>, vector<1x8x32xbf16>
    %135 = vector.shape_cast %134 : vector<1x8x32xbf16> to vector<8x32xbf16>
    %cst_57 = arith.constant dense<0.000000e+00> : vector<8x32xf32>
    %136 = tpu.matmul %133, %135, %cst_57 {dimension_numbers = #tpu.dot_dimension_numbers<[1], [0], [0], [1], [0, 0, 1, 1], [], []>} : vector<8x8xbf16>, vector<8x32xbf16>, vector<8x32xf32> -> vector<8x32xf32>
    %137 = arith.addf %105, %136 : vector<8x32xf32>
    %138 = vector.extract_strided_slice %27 {offsets = [0, 24], sizes = [8, 8], strides = [1, 1]} : vector<8x32xbf16> to vector<8x8xbf16>
    %139 = vector.extract_strided_slice %31 {offsets = [0, 24], sizes = [8, 8], strides = [1, 1]} : vector<8x32xbf16> to vector<8x8xbf16>
    %140 = vector.extract_strided_slice %3 {offsets = [0, 24], sizes = [8, 8], strides = [1, 1]} : vector<8x32xbf16> to vector<8x8xbf16>
    %141 = vector.extract_strided_slice %17 {offsets = [0, 24], sizes = [8, 8], strides = [1, 1]} : vector<8x32xbf16> to vector<8x8xbf16>
    %142 = vector.extract_strided_slice %23 {offsets = [0, 24], sizes = [64, 8], strides = [1, 1]} : vector<64x32xbf16> to vector<64x8xbf16>
    %143 = vector.shape_cast %142 : vector<64x8xbf16> to vector<8x8x8xbf16>
    %cst_58 = arith.constant dense<0.000000e+00> : vector<8x8xf32>
    %144 = tpu.matmul %138, %140, %cst_58 {dimension_numbers = #tpu.dot_dimension_numbers<[1], [1], [0], [0], [0, 0, 1, 0], [], []>} : vector<8x8xbf16>, vector<8x8xbf16>, vector<8x8xf32> -> vector<8x8xf32>
    %145 = arith.extf %139 : vector<8x8xbf16> to vector<8x8xf32>
    %146 = vector.shape_cast %145 : vector<8x8xf32> to vector<8x1x8xf32>
    %147 = arith.extf %143 : vector<8x8x8xbf16> to vector<8x8x8xf32>
    %148 = vector.broadcast %146 : vector<8x1x8xf32> to vector<8x8x8xf32>
    %149 = arith.mulf %148, %147 : vector<8x8x8xf32>
    %cst_59 = arith.constant dense<0.000000e+00> : vector<8x8xf32>
    %150 = vector.multi_reduction <add>, %149, %cst_59 [2] : vector<8x8x8xf32> to vector<8x8xf32>
    %151 = arith.addf %144, %150 : vector<8x8xf32>
    %152 = arith.addf %151, %40 : vector<8x8xf32>
    %cst_60 = arith.constant dense<0xFF800000> : vector<8xf32>
    %153 = vector.multi_reduction <maximumf>, %152, %cst_60 [1] : vector<8x8xf32> to vector<8xf32>
    %154 = vector.shape_cast %153 : vector<8xf32> to vector<8x1xf32>
    %155 = vector.broadcast %154 : vector<8x1xf32> to vector<8x8xf32>
    %156 = arith.subf %152, %155 : vector<8x8xf32>
    %157 = math.exp %156 : vector<8x8xf32>
    %cst_61 = arith.constant dense<0.000000e+00> : vector<8xf32>
    %158 = vector.multi_reduction <add>, %157, %cst_61 [1] : vector<8x8xf32> to vector<8xf32>
    %159 = vector.shape_cast %158 : vector<8xf32> to vector<8x1xf32>
    %160 = tpu.reciprocal %159 {approx = true} : vector<8x1xf32> -> vector<8x1xf32>
    %161 = vector.broadcast %160 : vector<8x1xf32> to vector<8x8xf32>
    %162 = arith.mulf %157, %161 : vector<8x8xf32>
    %163 = arith.truncf %162 : vector<8x8xf32> to vector<8x8xbf16>
    %cst_62 = arith.constant dense<0.000000e+00> : vector<8x8xf32>
    %164 = tpu.matmul %163, %141, %cst_62 {dimension_numbers = #tpu.dot_dimension_numbers<[1], [0], [0], [1], [0, 0, 1, 1], [], []>} : vector<8x8xbf16>, vector<8x8xbf16>, vector<8x8xf32> -> vector<8x8xf32>
    %165 = arith.truncf %164 : vector<8x8xf32> to vector<8x8xbf16>
    %c3 = arith.constant 3 : index
    %c0_63 = arith.constant 0 : index
    %c0_64 = arith.constant 0 : index
    %166 = vector.load %arg14[%c3, %c0_63, %c0_64] : memref<4x8x32xbf16, #tpu.memory_space<vmem>>, vector<1x8x32xbf16>
    %167 = vector.shape_cast %166 : vector<1x8x32xbf16> to vector<8x32xbf16>
    %cst_65 = arith.constant dense<0.000000e+00> : vector<8x32xf32>
    %168 = tpu.matmul %165, %167, %cst_65 {dimension_numbers = #tpu.dot_dimension_numbers<[1], [0], [0], [1], [0, 0, 1, 1], [], []>} : vector<8x8xbf16>, vector<8x32xbf16>, vector<8x32xf32> -> vector<8x32xf32>
    %169 = arith.addf %137, %168 : vector<8x32xf32>
    %c0_66 = arith.constant 0 : index
    %c0_67 = arith.constant 0 : index
    %170 = vector.load %arg15[%c0_66, %c0_67] : memref<1x32xf32, #tpu.memory_space<vmem>>, vector<1x32xf32>
    %171 = vector.broadcast %170 : vector<1x32xf32> to vector<8x32xf32>
    %172 = arith.addf %169, %171 : vector<8x32xf32>
    %cst_68 = arith.constant 0.000000e+00 : f32
    %173 = vector.broadcast %cst_68 : f32 to vector<8x32xf32>
    %174 = arith.cmpf oge, %172, %173 : vector<8x32xf32>
    %cst_69 = arith.constant 0.00999999977 : f32
    %175 = vector.broadcast %cst_69 : f32 to vector<8x32xf32>
    %176 = arith.mulf %175, %172 : vector<8x32xf32>
    %177 = arith.select %174, %172, %176 : vector<8x32xi1>, vector<8x32xf32>
    %178 = arith.addf %177, %1 : vector<8x32xf32>
    %c0_70 = arith.constant 0 : index
    %c0_71 = arith.constant 0 : index
    %179 = vector.load %arg16[%c0_70, %c0_71] : memref<1x32xf32, #tpu.memory_space<vmem>>, vector<1x32xf32>
    %c0_72 = arith.constant 0 : index
    %c0_73 = arith.constant 0 : index
    %180 = vector.load %arg17[%c0_72, %c0_73] : memref<1x32xf32, #tpu.memory_space<vmem>>, vector<1x32xf32>
    %cst_74 = arith.constant dense<0.000000e+00> : vector<8xf32>
    %181 = vector.multi_reduction <add>, %178, %cst_74 [1] : vector<8x32xf32> to vector<8xf32>
    %182 = vector.shape_cast %181 : vector<8xf32> to vector<8x1xf32>
    %cst_75 = arith.constant 3.200000e+01 : f32
    %183 = vector.broadcast %cst_75 : f32 to vector<8x1xf32>
    %184 = arith.divf %182, %183 : vector<8x1xf32>
    %185 = vector.broadcast %184 : vector<8x1xf32> to vector<8x32xf32>
    %186 = arith.subf %178, %185 : vector<8x32xf32>
    %187 = arith.mulf %186, %186 : vector<8x32xf32>
    %cst_76 = arith.constant dense<0.000000e+00> : vector<8xf32>
    %188 = vector.multi_reduction <add>, %187, %cst_76 [1] : vector<8x32xf32> to vector<8xf32>
    %189 = vector.shape_cast %188 : vector<8xf32> to vector<8x1xf32>
    %cst_77 = arith.constant 3.200000e+01 : f32
    %190 = vector.broadcast %cst_77 : f32 to vector<8x1xf32>
    %191 = arith.divf %189, %190 : vector<8x1xf32>
    %192 = vector.broadcast %184 : vector<8x1xf32> to vector<8x32xf32>
    %193 = arith.subf %178, %192 : vector<8x32xf32>
    %cst_78 = arith.constant 9.99999974E-6 : f32
    %194 = vector.broadcast %cst_78 : f32 to vector<8x1xf32>
    %195 = arith.addf %191, %194 : vector<8x1xf32>
    %196 = math.rsqrt %195 : vector<8x1xf32>
    %197 = vector.broadcast %196 : vector<8x1xf32> to vector<8x32xf32>
    %198 = arith.mulf %193, %197 : vector<8x32xf32>
    %199 = vector.broadcast %179 : vector<1x32xf32> to vector<8x32xf32>
    %200 = arith.mulf %198, %199 : vector<8x32xf32>
    %201 = vector.broadcast %180 : vector<1x32xf32> to vector<8x32xf32>
    %202 = arith.addf %200, %201 : vector<8x32xf32>
    %203 = arith.truncf %202 : vector<8x32xf32> to vector<8x32xbf16>
    %c0_79 = arith.constant 0 : index
    %c0_80 = arith.constant 0 : index
    %204 = vector.load %arg18[%c0_79, %c0_80] : memref<32x96xbf16, #tpu.memory_space<vmem>>, vector<32x96xbf16>
    %cst_81 = arith.constant dense<0.000000e+00> : vector<8x96xf32>
    %205 = tpu.matmul %203, %204, %cst_81 {dimension_numbers = #tpu.dot_dimension_numbers<[1], [0], [0], [1], [0, 0, 1, 1], [], []>} : vector<8x32xbf16>, vector<32x96xbf16>, vector<8x96xf32> -> vector<8x96xf32>
    %c0_82 = arith.constant 0 : index
    %c0_83 = arith.constant 0 : index
    %206 = vector.load %arg19[%c0_82, %c0_83] : memref<1x96xf32, #tpu.memory_space<vmem>>, vector<1x96xf32>
    %207 = vector.broadcast %206 : vector<1x96xf32> to vector<8x96xf32>
    %208 = arith.addf %205, %207 : vector<8x96xf32>
    %cst_84 = arith.constant 0.000000e+00 : f32
    %209 = vector.broadcast %cst_84 : f32 to vector<8x96xf32>
    %210 = arith.cmpf oge, %208, %209 : vector<8x96xf32>
    %cst_85 = arith.constant 0.00999999977 : f32
    %211 = vector.broadcast %cst_85 : f32 to vector<8x96xf32>
    %212 = arith.mulf %211, %208 : vector<8x96xf32>
    %213 = arith.select %210, %208, %212 : vector<8x96xi1>, vector<8x96xf32>
    %214 = arith.truncf %213 : vector<8x96xf32> to vector<8x96xbf16>
    %c0_86 = arith.constant 0 : index
    %c0_87 = arith.constant 0 : index
    %215 = vector.load %arg20[%c0_86, %c0_87] : memref<96x32xbf16, #tpu.memory_space<vmem>>, vector<96x32xbf16>
    %cst_88 = arith.constant dense<0.000000e+00> : vector<8x32xf32>
    %216 = tpu.matmul %214, %215, %cst_88 {dimension_numbers = #tpu.dot_dimension_numbers<[1], [0], [0], [1], [0, 0, 1, 1], [], []>} : vector<8x96xbf16>, vector<96x32xbf16>, vector<8x32xf32> -> vector<8x32xf32>
    %c0_89 = arith.constant 0 : index
    %c0_90 = arith.constant 0 : index
    %217 = vector.load %arg21[%c0_89, %c0_90] : memref<1x32xf32, #tpu.memory_space<vmem>>, vector<1x32xf32>
    %218 = vector.broadcast %217 : vector<1x32xf32> to vector<8x32xf32>
    %219 = arith.addf %216, %218 : vector<8x32xf32>
    %220 = arith.addf %219, %202 : vector<8x32xf32>
    %c0_91 = arith.constant 0 : index
    %c0_92 = arith.constant 0 : index
    %221 = vector.load %arg22[%c0_91, %c0_92] : memref<1x32xf32, #tpu.memory_space<vmem>>, vector<1x32xf32>
    %c0_93 = arith.constant 0 : index
    %c0_94 = arith.constant 0 : index
    %222 = vector.load %arg23[%c0_93, %c0_94] : memref<1x32xf32, #tpu.memory_space<vmem>>, vector<1x32xf32>
    %cst_95 = arith.constant dense<0.000000e+00> : vector<8xf32>
    %223 = vector.multi_reduction <add>, %220, %cst_95 [1] : vector<8x32xf32> to vector<8xf32>
    %224 = vector.shape_cast %223 : vector<8xf32> to vector<8x1xf32>
    %cst_96 = arith.constant 3.200000e+01 : f32
    %225 = vector.broadcast %cst_96 : f32 to vector<8x1xf32>
    %226 = arith.divf %224, %225 : vector<8x1xf32>
    %227 = vector.broadcast %226 : vector<8x1xf32> to vector<8x32xf32>
    %228 = arith.subf %220, %227 : vector<8x32xf32>
    %229 = arith.mulf %228, %228 : vector<8x32xf32>
    %cst_97 = arith.constant dense<0.000000e+00> : vector<8xf32>
    %230 = vector.multi_reduction <add>, %229, %cst_97 [1] : vector<8x32xf32> to vector<8xf32>
    %231 = vector.shape_cast %230 : vector<8xf32> to vector<8x1xf32>
    %cst_98 = arith.constant 3.200000e+01 : f32
    %232 = vector.broadcast %cst_98 : f32 to vector<8x1xf32>
    %233 = arith.divf %231, %232 : vector<8x1xf32>
    %234 = vector.broadcast %226 : vector<8x1xf32> to vector<8x32xf32>
    %235 = arith.subf %220, %234 : vector<8x32xf32>
    %cst_99 = arith.constant 9.99999974E-6 : f32
    %236 = vector.broadcast %cst_99 : f32 to vector<8x1xf32>
    %237 = arith.addf %233, %236 : vector<8x1xf32>
    %238 = math.rsqrt %237 : vector<8x1xf32>
    %239 = vector.broadcast %238 : vector<8x1xf32> to vector<8x32xf32>
    %240 = arith.mulf %235, %239 : vector<8x32xf32>
    %241 = vector.broadcast %221 : vector<1x32xf32> to vector<8x32xf32>
    %242 = arith.mulf %240, %241 : vector<8x32xf32>
    %243 = vector.broadcast %222 : vector<1x32xf32> to vector<8x32xf32>
    %244 = arith.addf %242, %243 : vector<8x32xf32>
    %c0_100 = arith.constant 0 : index
    %c0_101 = arith.constant 0 : index
    %c0_102 = arith.constant 0 : index
    %245 = vector.load %arg24[%c0_100, %c0_101, %c0_102] : memref<1x8x32xf32, #tpu.memory_space<vmem>>, vector<1x8x32xf32>
    %246 = vector.shape_cast %245 : vector<1x8x32xf32> to vector<8x32xf32>
    %247 = vector.shape_cast %244 : vector<8x32xf32> to vector<1x8x32xf32>
    tpu.vector_store %arg24[%c0_100, %c0_101, %c0_102], %247 {strides = array<i32>} : memref<1x8x32xf32, #tpu.memory_space<vmem>>, vector<1x8x32xf32>,
    return
  }
  func.func @transform_0(%arg0: i32, %arg1: i32) -> (i32, i32, i32) {
    %c0_i32 = arith.constant 0 : i32
    %c0_i32_0 = arith.constant 0 : i32
    return %arg0, %arg1, %c0_i32 : i32, i32, i32
  }
  func.func @transform_1(%arg0: i32, %arg1: i32) -> (i32, i32, i32) {
    %c0_i32 = arith.constant 0 : i32
    %c0_i32_0 = arith.constant 0 : i32
    %c0_i32_1 = arith.constant 0 : i32
    return %arg0, %c0_i32, %c0_i32_0 : i32, i32, i32
  }
  func.func @transform_2(%arg0: i32, %arg1: i32) -> (i32, i32, i32) {
    %c0_i32 = arith.constant 0 : i32
    %c0_i32_0 = arith.constant 0 : i32
    %c0_i32_1 = arith.constant 0 : i32
    return %arg0, %c0_i32, %c0_i32_0 : i32, i32, i32
  }
  func.func @transform_3(%arg0: i32, %arg1: i32) -> (i32, i32, i32) {
    %c0_i32 = arith.constant 0 : i32
    %c0_i32_0 = arith.constant 0 : i32
    return %arg0, %arg1, %c0_i32 : i32, i32, i32
  }
  func.func @transform_4(%arg0: i32, %arg1: i32) -> (i32, i32) {
    %c0_i32 = arith.constant 0 : i32
    %c0_i32_0 = arith.constant 0 : i32
    %c0_i32_1 = arith.constant 0 : i32
    return %c0_i32, %c0_i32_0 : i32, i32
  }
  func.func @transform_5(%arg0: i32, %arg1: i32) -> (i32, i32) {
    %c0_i32 = arith.constant 0 : i32
    %c0_i32_0 = arith.constant 0 : i32
    %c0_i32_1 = arith.constant 0 : i32
    return %c0_i32, %c0_i32_0 : i32, i32
  }
  func.func @transform_6(%arg0: i32, %arg1: i32) -> (i32, i32) {
    %c0_i32 = arith.constant 0 : i32
    %c0_i32_0 = arith.constant 0 : i32
    %c0_i32_1 = arith.constant 0 : i32
    return %c0_i32, %c0_i32_0 : i32, i32
  }
  func.func @transform_7(%arg0: i32, %arg1: i32) -> (i32, i32) {
    %c0_i32 = arith.constant 0 : i32
    %c0_i32_0 = arith.constant 0 : i32
    %c0_i32_1 = arith.constant 0 : i32
    return %c0_i32, %c0_i32_0 : i32, i32
  }
  func.func @transform_8(%arg0: i32, %arg1: i32) -> (i32, i32) {
    %c0_i32 = arith.constant 0 : i32
    %c0_i32_0 = arith.constant 0 : i32
    %c0_i32_1 = arith.constant 0 : i32
    return %c0_i32, %c0_i32_0 : i32, i32
  }
  func.func @transform_9(%arg0: i32, %arg1: i32) -> (i32, i32) {
    %c0_i32 = arith.constant 0 : i32
    %c0_i32_0 = arith.constant 0 : i32
    %c0_i32_1 = arith.constant 0 : i32
    return %c0_i32, %c0_i32_0 : i32, i32
  }
  func.func @transform_10(%arg0: i32, %arg1: i32) -> (i32, i32) {
    %c0_i32 = arith.constant 0 : i32
    %c0_i32_0 = arith.constant 0 : i32
    %c0_i32_1 = arith.constant 0 : i32
    return %c0_i32, %c0_i32_0 : i32, i32
  }
  func.func @transform_11(%arg0: i32, %arg1: i32) -> (i32, i32) {
    %c0_i32 = arith.constant 0 : i32
    %c0_i32_0 = arith.constant 0 : i32
    %c0_i32_1 = arith.constant 0 : i32
    return %c0_i32, %c0_i32_0 : i32, i32
  }
  func.func @transform_12(%arg0: i32, %arg1: i32) -> (i32, i32, i32) {
    %c0_i32 = arith.constant 0 : i32
    %c0_i32_0 = arith.constant 0 : i32
    %c0_i32_1 = arith.constant 0 : i32
    %c0_i32_2 = arith.constant 0 : i32
    return %c0_i32, %c0_i32_0, %c0_i32_1 : i32, i32, i32
  }
  func.func @transform_13(%arg0: i32, %arg1: i32) -> (i32, i32) {
    %c0_i32 = arith.constant 0 : i32
    %c0_i32_0 = arith.constant 0 : i32
    %c0_i32_1 = arith.constant 0 : i32
    return %c0_i32, %c0_i32_0 : i32, i32
  }
  func.func @transform_14(%arg0: i32, %arg1: i32) -> (i32, i32) {
    %c0_i32 = arith.constant 0 : i32
    %c0_i32_0 = arith.constant 0 : i32
    %c0_i32_1 = arith.constant 0 : i32
    return %c0_i32, %c0_i32_0 : i32, i32
  }
  func.func @transform_15(%arg0: i32, %arg1: i32) -> (i32, i32) {
    %c0_i32 = arith.constant 0 : i32
    %c0_i32_0 = arith.constant 0 : i32
    %c0_i32_1 = arith.constant 0 : i32
    return %c0_i32, %c0_i32_0 : i32, i32
  }
  func.func @transform_16(%arg0: i32, %arg1: i32) -> (i32, i32) {
    %c0_i32 = arith.constant 0 : i32
    %c0_i32_0 = arith.constant 0 : i32
    %c0_i32_1 = arith.constant 0 : i32
    return %c0_i32, %c0_i32_0 : i32, i32
  }
  func.func @transform_17(%arg0: i32, %arg1: i32) -> (i32, i32) {
    %c0_i32 = arith.constant 0 : i32
    %c0_i32_0 = arith.constant 0 : i32
    %c0_i32_1 = arith.constant 0 : i32
    return %c0_i32, %c0_i32_0 : i32, i32
  }
  func.func @transform_18(%arg0: i32, %arg1: i32) -> (i32, i32) {
    %c0_i32 = arith.constant 0 : i32
    %c0_i32_0 = arith.constant 0 : i32
    %c0_i32_1 = arith.constant 0 : i32
    return %c0_i32, %c0_i32_0 : i32, i32
  }
  func.func @transform_19(%arg0: i32, %arg1: i32) -> (i32, i32) {
    %c0_i32 = arith.constant 0 : i32
    %c0_i32_0 = arith.constant 0 : i32
    %c0_i32_1 = arith.constant 0 : i32
    return %c0_i32, %c0_i32_0 : i32, i32
  }
  func.func @transform_20(%arg0: i32, %arg1: i32) -> (i32, i32) {
    %c0_i32 = arith.constant 0 : i32
    %c0_i32_0 = arith.constant 0 : i32
    %c0_i32_1 = arith.constant 0 : i32
    return %c0_i32, %c0_i32_0 : i32, i32
  }
  func.func @transform_21(%arg0: i32, %arg1: i32) -> (i32, i32) {
    %c0_i32 = arith.constant 0 : i32
    %c0_i32_0 = arith.constant 0 : i32
    %c0_i32_1 = arith.constant 0 : i32
    return %c0_i32, %c0_i32_0 : i32, i32
  }
  func.func @transform_22(%arg0: i32, %arg1: i32) -> (i32, i32, i32) {
    %c0_i32 = arith.constant 0 : i32
    %c0_i32_0 = arith.constant 0 : i32
    return %arg0, %arg1, %c0_i32 : i32, i32, i32
  }
}

</mosaic_0001>

<bundles_post_ra>
// kernel: tpu_custom_call.1
= control target key start
LH: loop header
LB: loop body
LE: loop exit
PB: predicated region body
PF: predicated region fallthrough
CT: control target
= control target key end

     0   :  { %s3685_s0 = inlined_call_operand.vmem [shape: f32[2,8,32], index: 0, kind: input, shape index: {}]   ;;  %s3686_s1 = inlined_call_operand.vmem [shape: bf16[2,8,32], index: 1, kind: input, shape index: {}]   ;;  %s3687_s2 = inlined_call_operand.vmem [shape: f32[2,1,8], index: 2, kind: input, shape index: {}]   ;;  %s3688_s3 = inlined_call_operand.vmem [shape: bf16[2,64,32], index: 3, kind: input, shape index: {}]   ;;  %s3689_s4 = inlined_call_operand.vmem [shape: f32[1,32], index: 4, kind: input, shape index: {}]   ;;  %s3690_s5 = inlined_call_operand.vmem [shape: f32[1,32], index: 5, kind: input, shape index: {}]   ;;  %s3691_s6 = inlined_call_operand.vmem [shape: bf16[32,32], index: 6, kind: input, shape index: {}]   ;;  %s3692_s7 = inlined_call_operand.vmem [shape: f32[1,32], index: 7, kind: input, shape index: {}]   ;;  %s3693_s8 = inlined_call_operand.vmem [shape: bf16[32,32], index: 8, kind: input, shape index: {}]   ;;  %s3694_s9 = inlined_call_operand.vmem [shape: f32[1,32], index: 9, kind: input, shape index: {}]   ;;  %s3695_s10 = inlined_call_operand.vmem [shape: bf16[32,32], index: 10, kind: input, shape index: {}]   ;;  %s3696_s11 = inlined_call_operand.vmem [shape: f32[1,32], index: 11, kind: input, shape index: {}]   ;;  %s3697_s12 = inlined_call_operand.vmem [shape: bf16[4,8,32], index: 12, kind: input, shape index: {}]   ;;  %s3698_s13 = inlined_call_operand.vmem [shape: f32[1,32], index: 13, kind: input, shape index: {}]   ;;  %s3699_s14 = inlined_call_operand.vmem [shape: f32[1,32], index: 14, kind: input, shape index: {}]   ;;  %s3700_s15 = inlined_call_operand.vmem [shape: f32[1,32], index: 15, kind: input, shape index: {}]   ;;  %s3701_s16 = inlined_call_operand.vmem [shape: bf16[32,96], index: 16, kind: input, shape index: {}]   ;;  %s3702_s17 = inlined_call_operand.vmem [shape: f32[1,96], index: 17, kind: input, shape index: {}]   ;;  %s3703_s18 = inlined_call_operand.vmem [shape: bf16[96,32], index: 18, kind: input, shape index: {}]   ;;  %s3704_s19 = inlined_call_operand.vmem [shape: f32[1,32], index: 19, kind: input, shape index: {}]   ;;  %s3705_s20 = inlined_call_operand.vmem [shape: f32[1,32], index: 20, kind: input, shape index: {}]   ;;  %s3706_s21 = inlined_call_operand.vmem [shape: f32[1,32], index: 21, kind: input, shape index: {}]   ;;  %s3707_s22 = inlined_call_operand.hbm [shape: f32[2,8,32], index: 22, kind: output, shape index: {}]  }
   0x1   :  { %3720 = sst [smem:[#allocation13_spill]] %s3685_s0 }
   0x2   :  { %3721 = sst [smem:[#allocation14_spill]] %s3686_s1 }
   0x3   :  { %3722 = sst [smem:[#allocation15_spill]] %s3687_s2 }
   0x4   :  { %3723 = sst [smem:[#allocation16_spill]] %s3688_s3 }
   0x5   :  { %3724 = sst [smem:[#allocation17_spill]] %s3689_s4 }
   0x6   :  { %3725 = sst [smem:[#allocation18_spill]] %s3690_s5 }
   0x7   :  { %3726 = sst [smem:[#allocation19_spill]] %s3691_s6 }
   0x8   :  { %3727 = sst [smem:[#allocation20_spill]] %s3705_s20 }
   0x9   :  { %3728 = sst [smem:[#allocation21_spill]] %s3706_s21 }
   0xa   :  { %3729 = sst [smem:[#allocation22_spill]] %s3707_s22 }
   0xb   :  { %27 = vsyncpa [#allocation3], 0 }
   0xc   :  { %29 = vsyncpa [#allocation3 + $0x1], 0  ;;  %s3149_s3 = smov 0   ;;  %s3151_s28 = smov 0  }
   0xd   :  { %s3153_s29 = smov 0   ;;  %s3155_s30 = smov 0  }
   0xe   :  { %s3157_s4 = smov 0   ;;  %s3159_s0 = smov 0  }
   0xf LB: > { %3730 = sst [smem:[#allocation5_spill]] %s3004_s3  ;;  %s2589_s23 = sadd.s32 4294967295, %s3024_s0   ;;  %s3024_s0 = sphi %s3159_s0, %s35_s0   ;;  %s3020_s4 = sphi %s3157_s4, %s3758_s4   ;;  %s3016_s30 = sphi %s3155_s30, %s3757_s30   ;;  %s3012_s29 = sphi %s3153_s29, %s3756_s29   ;;  %s3008_s28 = sphi %s3151_s28, %s3760_s28   ;;  %s3004_s3 = sphi %s3149_s3, %s3759_s3  }
  0x10   : > { %3731 = sst [smem:[#allocation6_spill]] %s3012_s29  ;;  %s2590_s1 = sadd.s32 4294967294, %s3024_s0  }
  0x11   : > { %3732 = sst [smem:[#allocation7_spill]] %s3020_s4  ;;  %s47_s5 = sadd.s32 1, %s3020_s4 }
  0x12   : > { %3733 = sst [smem:[#allocation8_spill]] %s3024_s0  ;;  %s542_s24 = sadd.s32 1, %s3012_s29 }
  0x13   : > { %p49_p0 = scmp.ge.s32.totalorder %s47_s5, 2  ;;  %p552_p1 = scmp.ne.s32.totalorder %s3012_s29, %s3008_s28 }
  0x14   : > { %p553_p2 = scmp.eq.s32.totalorder %s2589_s23, 1  ;;  %p558_p3 = scmp.ne.s32.totalorder %s3008_s28, %s3004_s3 }
  0x15   : > { %s3762_s5 = smov (%p49_p0, %s47_s5), 0  ;;  %p559_p5 = scmp.eq.s32.totalorder %s2590_s1, 1 }
  0x16   : > { %3734 = sst [smem:[#allocation9_spill]] %s3762_s5  ;;  %p3189_p4 = por %p553_p2, %p552_p1 }
  0x17   : > { %s537_s25 = ssub.s32 %s3020_s4, %s3762_s5  ;;  %p2593_p6 = scmp.ge.s32.totalorder %s3024_s0, 1 }
  0x18   : > { %s3735_s6 = scalar_select %p3189_p4, 1, 0 }
  0x19   : > { %p540_p7 = scmp.eq.s32.totalorder %s537_s25, 0  ;;  %p3196_p8 = por %p559_p5, %p558_p3 }
  0x1a   : > { %3736 = sst [smem:[#allocation10_spill]] %s3735_s6  ;;  %p667_p9 = scmp.lt.s32.totalorder %s3024_s0, 3 }
  0x1b   : > { %s3737_s26 = scalar_select %p3196_p8, 1, 0 }
  0x1c   : > { %s3202_s2 = scalar_select %p540_p7, %s3012_s29, %s542_s24  }
  0x1d   : > { %3738 = sst [smem:[#allocation11_spill]] %s3737_s26  ;;  %p668_p10 = pnand %p2593_p6, %p667_p9 }
  0x1e   : > { %3739 = sst [smem:[#allocation12_spill]] %s3202_s2  ;;  %s3740_s3 = sld [smem:[#allocation19_spill]] (!%p668_p10)  ;;  %v3026_v1 = vmov (!%p668_p10), 0.0   ;;  %vm3027_vm0 = vmmov (!%p668_p10), 0   ;;  %vm806_vm1 = vcmask (!%p668_p10), 261120   ;;  %v2908_v3 = vld [vmem:[%s3693_s8] sm:$0xff] (!%p668_p10)   ;;  %v1063_v16 = vlaneseq (!%p668_p10) }
  0x1f   : > { %671 = sbr.rel (%p668_p10) target bundleno = 3716 (0xe84), region = 108  ;;  %2720 = vmatprep.subr.bf16.mxu0 (!%p668_p10), %v3026_v1  ;;  %2748 = vmatprep.subr.bf16.mxu1 (!%p668_p10), %v3026_v1  ;;  %p747_p11 = scmp.lt.s32.totalorder (!%p668_p10), %s3016_s30, 1  ;;  %v2909_v8 = vld [vmem:[%s3693_s8 + $0x8] sm:$0xff] (!%p668_p10)   ;;  %v2910_v9 = vld [vmem:[%s3695_s10] sm:$0xff] (!%p668_p10)   ;;  %vm1203_vm2 = vcmask (!%p668_p10), 64512   ;;  %vm1346_vm3 = vcmask (!%p668_p10), 1043456  }
  0x20   : > { %2724 = vmatprep.mubr.msk.bf16.mxu0 (!%p668_p10), %vm3027_vm0, %v3026_v1  ;;  %2750 = vmatprep.mubr.msk.bf16.mxu1 (!%p668_p10), %vm3027_vm0, %v3026_v1  ;;  %s3742_s5 = sld [smem:[#allocation13_spill]] (!%p668_p10)  ;;  %s3743_s26 = sld [smem:[#allocation14_spill]] (!%p668_p10)  ;;  %v2911_v11 = vld [vmem:[%s3695_s10 + $0x8] sm:$0xff] (!%p668_p10)   ;;  %v1064_v17 = vshrl.u32 (!%p668_p10), %v1063_v16, 7  ;;  %v1237_v18 = vand.u32 (!%p668_p10), 127, %v1063_v16  ;;  %vm1270_vm4 = vcmask (!%p668_p10), 1041409  }
  0x21   : > { %s3744_s23 = sld [smem:[#allocation16_spill]] (!%p668_p10)  ;;  %v3029_v22 = vmov (!%p668_p10), 1966171168   ;;  %v2599_v24 = vld [vmem:[%s3692_s7] ss:$0 sm:$0xff] (!%p668_p10)  ;;  %s3745_s25 = sld [smem:[#allocation17_spill]] (!%p668_p10) }
  0x22   : > { %v3267_v19 = vsub.s32 (!%p668_p10), %v1237_v18, %v1064_v17  ;;  %v1100_v23 = vunpack.c.l.s4 (!%p668_p10), %v3029_v22  ;;  %v2603_v38 = vld [vmem:[%s3694_s9] ss:$0 sm:$0xff] (!%p668_p10)  ;;  %v3299_v58 = vsub.s32 (!%p668_p10), 0, %v1064_v17  ;;  %s3747_s2 = sld [smem:[#allocation15_spill]] (!%p668_p10)  ;;  %vm1272_vm5 = vcmask (!%p668_p10), 1042434   ;;  %s744_s27 = sand.u32 (!%p668_p10), 1, %s3008_s28  }
  0x23   : > { %v2607_v50 = vld [vmem:[%s3696_s11] ss:$0 sm:$0xff] (!%p668_p10)  ;;  %vm1274_vm6 = vcmask (!%p668_p10), 1043459   ;;  %vm1276_vm8 = vcmask (!%p668_p10), 1044484   ;;  %vm1278_vm9 = vcmask (!%p668_p10), 1045509   ;;  %vm1280_vm10 = vcmask (!%p668_p10), 1046534  }
  0x24   : > { %s3741_s22 = smov (!%p668_p10), %s3740_s3  ;;  %v2906_v0 = vld [vmem:[%s3740_s3] sm:$0xff] (!%p668_p10)   ;;  %v1101_v29 = vunpack.c.0.s8 (!%p668_p10), %v1100_v23  ;;  %vm1282_vm11 = vcmask (!%p668_p10), 1047559   ;;  %vm2389_vm14 = vcmask (!%p668_p10), 785408   ;;  %s2465_s29 = scalar_lea.sflag (!%p668_p10), [#allocation3], %s744_s27 }
  0x25   : > { %2721 = vmatpush3.bf16.msra.mxu0 (!%p668_p10), %v2906_v0  ;;  %v2907_v2 = vld [vmem:[%s3741_s22 + $0x8] sm:$0xff] (!%p668_p10)   ;;  %s3028_s22 = smov (!%p668_p10), 120  }
  0x26   : > { %2722 = vmatprep.subr.bf16.mxu0 %v3026_v1  ;;  %s3219_s3 = scalar_select %p747_p11, %s3016_s30, 1  ;;  %v1104_v37 = vsub.s32 %v1101_v29, %v1064_v17 }
  0x27   : > { %v2618_v26 = vld [vmem:[%s3745_s25] ss:$0 sm:$0xff] }
  0x28   : > { %s2595_s24 = sshll.u32 %s3219_s3, 3  ;;  %s2596_s1 = sshll.u32 %s3219_s3, 2 }
  0x29   : > { %2723 = vmatpush3.bf16.msra.mxu0 %v2907_v2  ;;  %s3229_s4 = scalar_lea.vmem %s3742_s5, %s2595_s24  ;;  %s757_s0 = scalar_lea.vmem %s3743_s26, %s2596_s1 }
  0x2a   : > { %2728 = vmatprep.subr.bf16.mxu0 %v3026_v1  ;;  %v772_v4 = vld [vmem:[%s3229_s4] sm:$0xff]  ;;  %s2665_s21 = sshll.u32 %s3219_s3, 5  ;;  %s3746_s5 = sld [smem:[#allocation18_spill]] }
  0x2b   : > { %v773_v5 = vld [vmem:[%s757_s0] sm:$0xf]  ;;  %v782_v6 = vpack.c.bf16 %v772_v4, %v772_v4  ;;  %s769_s6 = scalar_lea.vmem %s3744_s23, %s2665_s21  ;;  %s760_s24 = scalar_lea.vmem %s3747_s2, %s3219_s3 }
  0x2c   : > { %v3240_v7 = vcombine.low %v773_v5, %v773_v5  ;;  %v2912_v10 = vld [vmem:[%s769_s6] sm:$0xff]   ;;  %v2913_v12 = vld [vmem:[%s769_s6 + $0x8] sm:$0xff]   ;;  %v2914_v13 = vld [vmem:[%s769_s6 + $0x10] sm:$0xff]   ;;  %v1288_v15 = vsel %vm1203_vm2, %v773_v5, 0  ;;  %s3031_s3 = smov 112   ;;  %s3032_s23 = smov 104  }
  0x2d   : > { %2725 = vmatmul.mubr.msk.bf16.vlgmr.msra.gmra.mrb[0].mxu0 %vm806_vm1, %v782_v6  ;;  %v2915_v14 = vld [vmem:[%s769_s6 + $0x18] sm:$0xff]   ;;  %2749 = vmatpush3.bf16.xpose.msra.mxu1 %v1288_v15  ;;  %s3749_s21 = sld [smem:[#allocation20_spill]]  ;;  %s3750_s6 = sld [smem:[#allocation21_spill]] }
  0x2e   : > { %1454 = vrot.lane.b32.xlu0 %v3240_v7, %s3028_s22  ;;  %2729 = vmatpush3.bf16.msra.mxu0 %v2908_v3  ;;  %s2662_s2 = sshll.u32 %s3016_s30, 7  ;;  %s3751_s1 = sld [smem:[#allocation22_spill]] }
  0x2f   : > { %2732 = vmatprep.mubr.msk.bf16.mxu0 %vm3027_vm0, %v3026_v1  ;;  %2730 = vmatprep.subr.bf16.mxu0 %v3026_v1  ;;  %s3033_s30 = smov [#allocation2]  }
  0x30   : > { %2754 = vmatprep.subr.bf16.mxu1 %v3026_v1  ;;  %v2619_v27 = vld [vmem:[%s3746_s5] ss:$0 sm:$0xff] }
  0x32   : > { %2731 = vmatpush3.bf16.msra.mxu0 %v2909_v8 }
  0x33   : > { %2736 = vmatprep.subr.bf16.mxu0 %v2910_v9 }
  0x34   : > { %s3637_s25 = scalar_lea.hbm %s3751_s1, %s2662_s2 }
  0x35   : > { %2733 = vmatmul.mubr.msk.bf16.vlgmr.msra.gmra.mrb[4].mxu0 %vm806_vm1, %v773_v5 }
  0x36   : > { %2737 = vmatpush3.bf16.msra.mxu0 %v2910_v9  ;;  %2740 = vmatprep.mubr.msk.bf16.mxu0 %vm806_vm1, %v2912_v10 }
  0x37   : > { %2738 = vmatprep.subr.bf16.mxu0 %v2911_v11 }
  0x3a   : > { %2739 = vmatpush3.bf16.msra.mxu0 %v2911_v11 }
  0x3b   : > { %2760 = vmatprep.subr.bf16.mxu0 %v3026_v1 }
  0x3d   : > { %2741 = vmatmul.mubr.msk.bf16.vlgmr.msra.gmra.mrb[8].mxu0 %vm806_vm1, %v2913_v12 }
  0x3e   : > { %2744 = vmatprep.mubr.msk.bf16.mxu0 %vm806_vm1, %v2914_v13 }
  0x45   : > { %2745 = vmatmul.mubr.msk.bf16.gmra.mrb[12].mxu0 %vm806_vm1, %v2915_v14 }
  0x46   : > { %2762 = vmatprep.mubr.msk.bf16.mxu0 %vm3027_vm0, %v3026_v1 }
  0xa0   : > { %v1455_v20 = vpop.permute.xlu0 %1454 }
  0xa1   : > { %v1508_v21 = vsel %vm1203_vm2, %v1455_v20, 0 }
  0xa2   : > { %2761 = vmatpush3.bf16.xpose.msra.mxu0 %v1508_v21 }
  0xa3   : > { %2772 = vmatprep.subr.bf16.mxu0 %v3026_v1 }
 0x100   : > { %v844_v25 = vpop.f32.mrb[0].mxu0 }
 0x101   : > { %v845_v28 = vadd.f32 %v2599_v24, %v844_v25  ;;  %v2726_v30 = vpop.f32.mrb[1].mxu0 }
 0x102   : > { %v847_v31 = vpop.f32.mrb[2].mxu0 }
 0x103   : > { %v1048_v32 = vadd.f32 %v2618_v26, %v845_v28  ;;  %v1057_v33 = vadd.f32 %v2619_v27, %v845_v28  ;;  %v2727_v34 = vpop.f32.mrb[3].mxu0 }
 0x105   : > { %v3280_v35 = vpack.c.bf16 %v1048_v32, %v1048_v32  ;;  %v1058_v36 = vpack.c.bf16 %v1057_v33, %v1057_v33 }
 0x107   : > { %v1096_v39 = vunpack.c.l.bf16 %v1058_v36  ;;  %1449 = vrot.lane.b32.xlu0 %v3280_v35, %s3028_s22  ;;  %2751 = vmatmul.mubr.msk.bf16.vlgmr.msra.gmra.mrb[0].mxu1 %vm1203_vm2, %v3280_v35 }
 0x108   : > { %v910_v40 = vpop.f32.mrb[4].mxu0  ;;  %2756 = vmatprep.mubr.msk.bf16.mxu1 %vm3027_vm0, %v3026_v1 }
 0x109   : > { %v1105_v41 = vrot.slane %v1096_v39, %v1104_v37  ;;  %v911_v42 = vadd.f32 %v2603_v38, %v910_v40  ;;  %v2734_v43 = vpop.f32.mrb[5].mxu0  ;;  %v1098_v45 = vcombine.high %v1096_v39, %v1096_v39 }
 0x10a   : > { %v913_v44 = vpop.f32.mrb[6].mxu0 }
 0x10b   : > { %v1113_v46 = vcombine.high %v1105_v41, %v1105_v41  ;;  %v3291_v47 = vpack.c.bf16 %v911_v42, %v911_v42  ;;  %v2735_v48 = vpop.f32.mrb[7].mxu0  ;;  %v1121_v49 = vrot.slane %v1105_v41, %v1104_v37  ;;  %v1112_v52 = vrot.slane %v1098_v45, %v1104_v37 }
 0x10d   : > { %v1348_v51 = vsel %vm1346_vm3, %v3291_v47, 0  ;;  %v1135_v53 = vrot.slane %v1113_v46, %v1104_v37  ;;  %v1143_v56 = vcombine.high %v1121_v49, %v1121_v49  ;;  %v1114_v61 = vcombine.high %v1112_v52, %v1112_v52 }
 0x10e   : > { %2755 = vmatpush3.bf16.msra.mxu1 %v1348_v51  ;;  %v1128_v9 = vrot.slane %v1112_v52, %v1104_v37  ;;  %v1158_v11 = vrot.slane %v1121_v49, %v3299_v58 }
 0x10f   : > { %2766 = vmatprep.subr.bf16.mxu1 %v3026_v1  ;;  %v1145_v0 = vcombine.high %v1135_v53, %v1135_v53  ;;  %v1166_v6 = vrot.slane %v1143_v56, %v3299_v58  ;;  %v1142_v16 = vrot.slane %v1114_v61, %v1104_v37  ;;  %v1162_v20 = vrot.slane %v1135_v53, %v3299_v58 }
 0x110   : > { %v2742_v54 = vpop.f32.mrb[8].mxu0  ;;  %v1144_v24 = vcombine.high %v1128_v9, %v1128_v9  ;;  %v1174_v40 = vrot.slane %v1128_v9, %v3299_v58 }
 0x111   : > { %v1015_v55 = vadd.f32 %v2742_v54, %v2607_v50  ;;  %v1006_v57 = vpop.f32.mrb[9].mxu0  ;;  %v1170_v15 = vrot.slane %v1145_v0, %v3299_v58  ;;  %v1146_v31 = vcombine.high %v1142_v16, %v1142_v16  ;;  %v1178_v48 = vrot.slane %v1142_v16, %v3299_v58 }
 0x112   : > { %v1007_v59 = vadd.f32 %v2607_v50, %v1006_v57  ;;  %v2743_v60 = vpop.f32.mrb[10].mxu0  ;;  %v1182_v37 = vrot.slane %v1144_v24, %v3299_v58 }
 0x113   : > { %v2668_v62 = vpack.c.bf16 %v1015_v55, %v1015_v55  ;;  %v1018_v63 = vadd.f32 %v2743_v60, %v2607_v50  ;;  %v1009_v2 = vpop.f32.mrb[11].mxu0  ;;  %v1186_v44 = vrot.slane %v1146_v31, %v3299_v58  ;;  %v1059_v31 = vld [vmem:[%s760_s24] sm:$0x1] }
 0x114   : > { %v2666_v3 = vpack.c.bf16 %v1007_v59, %v1007_v59  ;;  %v1010_v4 = vadd.f32 %v2607_v50, %v1009_v2  ;;  %vm1060_vm7 = vcmp.gt.f32.partialorder %v1059_v31, 0.5 }
 0x115   : > { %v1149_v5 = vunpack.c.l.bf16 %v2668_v62  ;;  %v2669_v8 = vpack.c.bf16 %v1018_v63, %v1018_v63 }
 0x116   : > { %v1147_v10 = vunpack.c.l.bf16 %v2666_v3  ;;  %v2667_v12 = vpack.c.bf16 %v1010_v4, %v1010_v4 }
 0x117   : > { %v3303_v13 = vmul.f32 %v1166_v6, %v1149_v5  ;;  %v1150_v14 = vunpack.c.l.bf16 %v2669_v8 }
 0x118   : > { %v3306_v17 = vmul.f32 %v1158_v11, %v1147_v10  ;;  %v1148_v18 = vunpack.c.l.bf16 %v2667_v12  ;;  %v2746_v21 = vpop.f32.mrb[12].mxu0 }
 0x119   : > { %v3309_v22 = vmul.f32 %v1170_v15, %v1150_v14  ;;  %v1031_v23 = vadd.f32 %v2746_v21, %v2607_v50  ;;  %1404 = vrot.lane.b32.xlu0 %v3303_v13, %s3028_s22  ;;  %v1022_v25 = vpop.f32.mrb[13].mxu0  ;;  %v1210_v52 = vsel %vm1203_vm2, %v3303_v13, 0.0 }
 0x11a   : > { %v3313_v26 = vmul.f32 %v1162_v20, %v1148_v18  ;;  %v1023_v27 = vadd.f32 %v2607_v50, %v1022_v25  ;;  %v2747_v28 = vpop.f32.mrb[14].mxu0  ;;  %1400 = vrot.lane.b32.xlu1 %v3306_v17, %s3028_s22  ;;  %v1204_v51 = vsel %vm1203_vm2, %v3306_v17, 0.0 }
 0x11b   : > { %v2672_v29 = vpack.c.bf16 %v1031_v23, %v1031_v23  ;;  %v1034_v30 = vadd.f32 %v2747_v28, %v2607_v50  ;;  %v1025_v32 = vpop.f32.mrb[15].mxu0  ;;  %v1213_v53 = vsel %vm1203_vm2, %v3309_v22, 0.0 }
 0x11c   : > { %v2670_v33 = vpack.c.bf16 %v1023_v27, %v1023_v27  ;;  %v1026_v34 = vadd.f32 %v2607_v50, %v1025_v32  ;;  %v1207_v54 = vsel %vm1203_vm2, %v3313_v26, 0.0 }
 0x11d   : > { %v1153_v36 = vunpack.c.l.bf16 %v2672_v29  ;;  %v2673_v38 = vpack.c.bf16 %v1034_v30, %v1034_v30 }
 0x11e   : > { %v1151_v39 = vunpack.c.l.bf16 %v2670_v33  ;;  %v2671_v41 = vpack.c.bf16 %v1026_v34, %v1026_v34  ;;  %1406 = vrot.lane.b32.xlu1 %v3309_v22, %s3028_s22 }
 0x11f   : > { %v3321_v42 = vmul.f32 %v1182_v37, %v1153_v36  ;;  %v1154_v43 = vunpack.c.l.bf16 %v2673_v38 }
 0x120   : > { %v3324_v45 = vmul.f32 %v1174_v40, %v1151_v39  ;;  %v1152_v46 = vunpack.c.l.bf16 %v2671_v41 }
 0x121   : > { %v3327_v49 = vmul.f32 %v1186_v44, %v1154_v43  ;;  %v1222_v59 = vsel %vm1203_vm2, %v3321_v42, 0.0  ;;  %v3030_v44 = vmov -1000000.0  }
 0x122   : > { %v3329_v50 = vmul.f32 %v1178_v48, %v1152_v46  ;;  %1408 = vrot.lane.b32.xlu0 %v3324_v45, %s3028_s22  ;;  %1402 = vrot.lane.b32.xlu1 %v3313_v26, %s3028_s22  ;;  %v1216_v56 = vsel %vm1203_vm2, %v3324_v45, 0.0  ;;  %v1061_v46 = vsel %vm1060_vm7, 0.0, %v3030_v44 }
 0x123   : > { %v1225_v55 = vsel %vm1203_vm2, %v3327_v49, 0.0 }
 0x124   : > { %v1219_v57 = vsel %vm1203_vm2, %v3329_v50, 0.0 }
 0x126   : > { %1412 = vrot.lane.b32.xlu0 %v3321_v42, %s3028_s22  ;;  %1410 = vrot.lane.b32.xlu1 %v3329_v50, %s3028_s22 }
 0x12a   : > { %1414 = vrot.lane.b32.xlu1 %v3327_v49, %s3028_s22 }
 0x145   : > { %1205 = vadd.xlane.f32.xlu0 %v1204_v51 }
 0x149   : > { %1211 = vadd.xlane.f32.xlu0 %v1210_v52 }
 0x14d   : > { %1214 = vadd.xlane.f32.xlu0 %v1213_v53 }
 0x14e   : > { %1208 = vadd.xlane.f32.xlu1 %v1207_v54 }
 0x151   : > { %1226 = vadd.xlane.f32.xlu0 %v1225_v55  ;;  %v3387_v55 = vrot.slane %v1061_v46, %v3299_v58 }
 0x152   : > { %1217 = vadd.xlane.f32.xlu1 %v1216_v56 }
 0x155   : > { %1220 = vadd.xlane.f32.xlu0 %v1219_v57 }
 0x156   : > { %1223 = vadd.xlane.f32.xlu1 %v1222_v59 }
 0x179   : > { %v1450_v60 = vpop.permute.xlu0 %1449 }
 0x17a   : > { %2763 = vmatmul.mubr.msk.bf16.vlgmr.msra.gmra.mrb[16].mxu0 %vm1203_vm2, %v1450_v60 }
 0x17b   : > { %2774 = vmatprep.mubr.msk.bf16.mxu0 %vm3027_vm0, %v3026_v1 }
 0x18b   : > { %v1405_v61 = vpop.permute.xlu0 %1404 }
 0x18c   : > { %v1401_v62 = vpop.permute.xlu1 %1400  ;;  %v1430_v63 = vsel %vm1203_vm2, %v1405_v61, 0.0 }
 0x18d   : > { %1431 = vadd.xlane.f32.xlu1 %v1430_v63  ;;  %v1424_v2 = vsel %vm1203_vm2, %v1401_v62, 0.0 }
 0x190   : > { %v1407_v0 = vpop.permute.xlu1 %1406 }
 0x191   : > { %1425 = vadd.xlane.f32.xlu1 %v1424_v2  ;;  %v1433_v3 = vsel %vm1203_vm2, %v1407_v0, 0.0 }
 0x192   : > { %1434 = vadd.xlane.f32.xlu0 %v1433_v3 }
 0x194   : > { %v1409_v4 = vpop.permute.xlu0 %1408  ;;  %v1403_v5 = vpop.permute.xlu1 %1402 }
 0x195   : > { %v1436_v6 = vsel %vm1203_vm2, %v1409_v4, 0.0  ;;  %v1427_v8 = vsel %vm1203_vm2, %v1403_v5, 0.0 }
 0x196   : > { %1437 = vadd.xlane.f32.xlu1 %v1436_v6  ;;  %1428 = vadd.xlane.f32.xlu0 %v1427_v8 }
 0x198   : > { %v1413_v9 = vpop.permute.xlu0 %1412  ;;  %v1411_v10 = vpop.permute.xlu1 %1410 }
 0x199   : > { %v1442_v11 = vsel %vm1203_vm2, %v1413_v9, 0.0  ;;  %v1439_v12 = vsel %vm1203_vm2, %v1411_v10, 0.0 }
 0x19a   : > { %1443 = vadd.xlane.f32.xlu1 %v1442_v11  ;;  %1440 = vadd.xlane.f32.xlu0 %v1439_v12 }
 0x19c   : > { %v1415_v14 = vpop.permute.xlu1 %1414 }
 0x19d   : > { %v1445_v15 = vsel %vm1203_vm2, %v1415_v14, 0.0 }
 0x19e   : > { %1446 = vadd.xlane.f32.xlu0 %v1445_v15 }
 0x1d2   : > { %v1206_v16 = vpop.xlane.xlu0 %1205 }
 0x1d3   : > { %v1241_v25 = vrot.slane %v1206_v16, %v3267_v19 }
 0x1d6   : > { %v1212_v18 = vpop.xlane.xlu0 %1211 }
 0x1d7   : > { %v1249_v29 = vrot.slane %v1212_v18, %v3267_v19 }
 0x1da   : > { %v1324_v20 = vpop.f32.mrb[0].mxu1  ;;  %v1215_v21 = vpop.xlane.xlu0 %1214 }
 0x1db   : > { %v2752_v23 = vpop.f32.mrb[1].mxu1  ;;  %v1209_v24 = vpop.xlane.xlu1 %1208  ;;  %v1253_v34 = vrot.slane %v1215_v21, %v3267_v19 }
 0x1dc   : > { %v1245_v27 = vrot.slane %v1209_v24, %v3267_v19  ;;  %v1327_v28 = vpop.f32.mrb[2].mxu1 }
 0x1dd   : > { %v2753_v30 = vpop.f32.mrb[3].mxu1 }
 0x1de   : > { %v1271_v32 = vsel %vm1270_vm4, %v1245_v27, %v1241_v25  ;;  %v1227_v33 = vpop.xlane.xlu0 %1226 }
 0x1df   : > { %v1273_v36 = vsel %vm1272_vm5, %v1249_v29, %v1271_v32  ;;  %v1218_v37 = vpop.xlane.xlu1 %1217  ;;  %v1269_v52 = vrot.slane %v1227_v33, %v3267_v19 }
 0x1e0   : > { %v1257_v38 = vrot.slane %v1218_v37, %v3267_v19  ;;  %v1275_v39 = vsel %vm1274_vm6, %v1253_v34, %v1273_v36 }
 0x1e2   : > { %v1221_v40 = vpop.xlane.xlu0 %1220  ;;  %v1277_v48 = vsel %vm1276_vm8, %v1257_v38, %v1275_v39 }
 0x1e3   : > { %v1261_v41 = vrot.slane %v1221_v40, %v3267_v19  ;;  %v1224_v43 = vpop.xlane.xlu1 %1223 }
 0x1e4   : > { %v1265_v51 = vrot.slane %v1224_v43, %v3267_v19 }
 0x1e5   : > { %v1279_v53 = vsel %vm1278_vm9, %v1261_v41, %v1277_v48 }
 0x1e6   : > { %v1281_v54 = vsel %vm1280_vm10, %v1265_v51, %v1279_v53 }
 0x1e7   : > { %v1283_v56 = vsel %vm1282_vm11, %v1269_v52, %v1281_v54 }
 0x1e8   : > { %v1325_v57 = vadd.f32 %v1324_v20, %v1283_v56 }
 0x1ea   : > { %v1330_v59 = vadd.f32 %v1325_v57, %v3387_v55 }
 0x1ec   : > { %v1331_v60 = vsel %vm1203_vm2, %v1330_v59, -inf }
 0x1ed   : > { %1332 = vmax.xlane.f32.xlu1 %v1331_v60 }
 0x21a   : > { %v1432_v62 = vpop.xlane.xlu1 %1431 }
 0x21b   : > { %v1475_v58 = vrot.slane %v1432_v62, %v3267_v19 }
 0x21e   : > { %v1426_v0 = vpop.xlane.xlu1 %1425 }
 0x21f   : > { %v1435_v61 = vpop.xlane.xlu0 %1434  ;;  %v1467_v3 = vrot.slane %v1426_v0, %v3267_v19 }
 0x220   : > { %v1479_v9 = vrot.slane %v1435_v61, %v3267_v19 }
 0x223   : > { %v1429_v63 = vpop.xlane.xlu0 %1428  ;;  %v1438_v5 = vpop.xlane.xlu1 %1437 }
 0x224   : > { %v1471_v2 = vrot.slane %v1429_v63, %v3267_v19  ;;  %v1483_v11 = vrot.slane %v1438_v5, %v3267_v19 }
 0x226   : > { %v1496_v4 = vsel %vm1270_vm4, %v1471_v2, %v1467_v3  ;;  %v1391_v3 = vld [vmem:[%s3697_s12] sm:$0xf] }
 0x227   : > { %v1497_v6 = vsel %vm1272_vm5, %v1475_v58, %v1496_v4  ;;  %v1441_v8 = vpop.xlane.xlu0 %1440  ;;  %v1444_v12 = vpop.xlane.xlu1 %1443 }
 0x228   : > { %v1498_v10 = vsel %vm1274_vm6, %v1479_v9, %v1497_v6  ;;  %v1487_v14 = vrot.slane %v1441_v8, %v3267_v19  ;;  %v1491_v18 = vrot.slane %v1444_v12, %v3267_v19 }
 0x229   : > { %v1499_v15 = vsel %vm1276_vm8, %v1483_v11, %v1498_v10  ;;  %v1665_v10 = vsel %vm1346_vm3, %v1391_v3, 0 }
 0x22a   : > { %v1500_v20 = vsel %vm1278_vm9, %v1487_v14, %v1499_v15 }
 0x22b   : > { %v1447_v16 = vpop.xlane.xlu0 %1446  ;;  %v1501_v23 = vsel %vm1280_vm10, %v1491_v18, %v1500_v20 }
 0x22c   : > { %v1495_v21 = vrot.slane %v1447_v16, %v3267_v19 }
 0x22e   : > { %v1502_v24 = vsel %vm1282_vm11, %v1495_v21, %v1501_v23  ;;  %v2633_v21 = vld [vmem:[%s3697_s12 + $0x4] sm:$0xf] }
 0x22f   : > { %v1619_v23 = vsel %vm1346_vm3, %v2633_v21, 0 }
 0x230   : > { %2773 = vmatpush3.bf16.msra.mxu0 %v1619_v23 }
 0x231   : > { %2784 = vmatprep.subr.bf16.mxu0 %v3026_v1 }
 0x24d   : > { %v1544_v25 = vpop.f32.mrb[16].mxu0 }
 0x24e   : > { %v1545_v27 = vadd.f32 %v1544_v25, %v1502_v24  ;;  %v2764_v28 = vpop.f32.mrb[17].mxu0 }
 0x24f   : > { %v1547_v29 = vpop.f32.mrb[18].mxu0 }
 0x250   : > { %v2765_v30 = vpop.f32.mrb[19].mxu0  ;;  %v1550_v31 = vadd.f32 %v1545_v27, %v3387_v55 }
 0x252   : > { %v1551_v32 = vsel %vm1203_vm2, %v1550_v31, -inf }
 0x253   : > { %1552 = vmax.xlane.f32.xlu0 %v1551_v32 }
 0x27a   : > { %v1333_v33 = vpop.xlane.xlu1 %1332 }
 0x27b   : > { %v1334_v34 = vsub.f32 %v1330_v59, %v1333_v33 }
 0x27d   : > { %v1335_v36 = vmul.f32 1.442695, %v1334_v34 }
 0x27f   : > { %2925 = vpow2.f32 %v1335_v36 }
 0x289   : > { %v2926_v37 = vpop.eup %2925 }
 0x28a   : > { %v1337_v38 = vsel %vm1203_vm2, %v2926_v37, 0.0 }
 0x28b   : > { %1338 = vadd.xlane.f32.xlu1 %v1337_v38 }
 0x29c   : > { %1564 = vrot.lane.b32.xlu1 %v3291_v47, %s3028_s22 }
 0x2a0   : > { %1755 = vrot.lane.b32.xlu1 %v3280_v35, %s3031_s3 }
 0x2a4   : > { %1707 = vrot.lane.b32.xlu1 %v3306_v17, %s3031_s3 }
 0x2a8   : > { %1711 = vrot.lane.b32.xlu1 %v3303_v13, %s3031_s3 }
 0x2ac   : > { %1715 = vrot.lane.b32.xlu1 %v3324_v45, %s3031_s3 }
 0x2b0   : > { %1719 = vrot.lane.b32.xlu1 %v3321_v42, %s3031_s3 }
 0x2e0   : > { %v1553_v39 = vpop.xlane.xlu0 %1552 }
 0x2e1   : > { %v1554_v40 = vsub.f32 %v1550_v31, %v1553_v39 }
 0x2e3   : > { %v1555_v41 = vmul.f32 1.442695, %v1554_v40 }
 0x2e5   : > { %2927 = vpow2.f32 %v1555_v41 }
 0x2ef   : > { %v2928_v43 = vpop.eup %2927 }
 0x2f0   : > { %v1557_v44 = vsel %vm1203_vm2, %v2928_v43, 0.0 }
 0x2f1   : > { %1558 = vadd.xlane.f32.xlu0 %v1557_v44 }
 0x307   : > { %1757 = vrot.lane.b32.xlu0 %v3240_v7, %s3031_s3 }
 0x30b   : > { %1709 = vrot.lane.b32.xlu0 %v3313_v26, %s3031_s3 }
 0x30f   : > { %1713 = vrot.lane.b32.xlu0 %v3309_v22, %s3031_s3 }
 0x313   : > { %1717 = vrot.lane.b32.xlu0 %v3329_v50, %s3031_s3 }
 0x317   : > { %1721 = vrot.lane.b32.xlu0 %v3327_v49, %s3031_s3 }
 0x318   : > { %v1339_v46 = vpop.xlane.xlu1 %1338 }
 0x319   : > { %2929 = vrcp.f32 %v1339_v46 }
 0x31c   : > { %v1565_v48 = vpop.permute.xlu1 %1564 }
 0x31d   : > { %v1570_v59 = vsel %vm1346_vm3, %v1565_v48, 0 }
 0x320   : > { %v3433_v51 = vpop.permute.xlu1 %1755 }
 0x323   : > { %v2930_v52 = vpop.eup %2929 }
 0x324   : > { %v1341_v53 = vmul.f32 %v2930_v52, %v2926_v37  ;;  %v1708_v54 = vpop.permute.xlu1 %1707 }
 0x325   : > { %v1731_v56 = vsel %vm1203_vm2, %v1708_v54, 0.0 }
 0x326   : > { %1732 = vadd.xlane.f32.xlu1 %v1731_v56  ;;  %v1342_v57 = vpack.c.bf16 %v1341_v53, %v1341_v53 }
 0x328   : > { %2757 = vmatmul.mubr.msk.bf16.vlgmr.msra.gmra.mrb[4].mxu1 %vm1203_vm2, %v1342_v57  ;;  %v1712_v62 = vpop.permute.xlu1 %1711 }
 0x329   : > { %2767 = vmatpush3.bf16.msra.mxu1 %v1570_v59  ;;  %2768 = vmatprep.mubr.msk.bf16.mxu1 %vm3027_vm0, %v3026_v1  ;;  %v1737_v6 = vsel %vm1203_vm2, %v1712_v62, 0.0 }
 0x32a   : > { %2778 = vmatprep.subr.bf16.mxu1 %v3026_v1 }
 0x32c   : > { %v1716_v4 = vpop.permute.xlu1 %1715 }
 0x32d   : > { %v1743_v12 = vsel %vm1203_vm2, %v1716_v4, 0.0 }
 0x330   : > { %v1720_v15 = vpop.permute.xlu1 %1719 }
 0x331   : > { %v1749_v18 = vsel %vm1203_vm2, %v1720_v15, 0.0 }
 0x37e   : > { %v1559_v60 = vpop.xlane.xlu0 %1558 }
 0x37f   : > { %2931 = vrcp.f32 %v1559_v60 }
 0x382   : > { %v1758_v61 = vpop.permute.xlu0 %1757 }
 0x383   : > { %v1811_v31 = vsel %vm1203_vm2, %v1758_v61, 0 }
 0x386   : > { %v1710_v63 = vpop.permute.xlu0 %1709 }
 0x387   : > { %v1734_v0 = vsel %vm1203_vm2, %v1710_v63, 0.0 }
 0x388   : > { %1735 = vadd.xlane.f32.xlu0 %v1734_v0 }
 0x389   : > { %v2932_v2 = vpop.eup %2931 }
 0x38a   : > { %v1561_v58 = vmul.f32 %v2932_v2, %v2928_v43  ;;  %v1714_v5 = vpop.permute.xlu0 %1713 }
 0x38b   : > { %v1740_v8 = vsel %vm1203_vm2, %v1714_v5, 0.0 }
 0x38c   : > { %1738 = vadd.xlane.f32.xlu0 %v1737_v6  ;;  %1741 = vadd.xlane.f32.xlu1 %v1740_v8  ;;  %v1562_v9 = vpack.c.bf16 %v1561_v58, %v1561_v58 }
 0x38e   : > { %2769 = vmatmul.mubr.msk.bf16.vlgmr.msra.gmra.mrb[8].mxu1 %vm1203_vm2, %v1562_v9  ;;  %v1718_v11 = vpop.permute.xlu0 %1717 }
 0x38f   : > { %v1746_v14 = vsel %vm1203_vm2, %v1718_v11, 0.0  ;;  %2779 = vmatpush3.bf16.msra.mxu1 %v1665_v10  ;;  %2780 = vmatprep.mubr.msk.bf16.mxu1 %vm3027_vm0, %v3026_v1 }
 0x390   : > { %1744 = vadd.xlane.f32.xlu0 %v1743_v12  ;;  %1747 = vadd.xlane.f32.xlu1 %v1746_v14 }
 0x391   : > { %2790 = vmatprep.subr.bf16.mxu1 %v3026_v1 }
 0x392   : > { %v1722_v16 = vpop.permute.xlu0 %1721 }
 0x393   : > { %v1752_v20 = vsel %vm1203_vm2, %v1722_v16, 0.0 }
 0x394   : > { %1750 = vadd.xlane.f32.xlu0 %v1749_v18  ;;  %1753 = vadd.xlane.f32.xlu1 %v1752_v20 }
 0x3b3   : > { %v1733_v43 = vpop.xlane.xlu1 %1732 }
 0x3b4   : > { %v1770_v54 = vrot.slane %v1733_v43, %v3267_v19 }
 0x3fb   : > { %v1384_v24 = vpop.f32.mrb[4].mxu1 }
 0x3fc   : > { %v1390_v25 = vpack.c.bf16 %v1384_v24, %v1384_v24  ;;  %v2758_v27 = vpop.f32.mrb[5].mxu1 }
 0x3fd   : > { %v1387_v28 = vpop.f32.mrb[6].mxu1 }
 0x3fe   : > { %v2759_v29 = vpop.f32.mrb[7].mxu1  ;;  %2781 = vmatmul.mubr.msk.bf16.vlgmr.msra.gmra.mrb[12].mxu1 %vm1203_vm2, %v1390_v25 }
 0x3ff   : > { %2792 = vmatprep.mubr.msk.bf16.mxu1 %vm3027_vm0, %v3026_v1 }
 0x415   : > { %v1736_v41 = vpop.xlane.xlu0 %1735 }
 0x416   : > { %v1774_v48 = vrot.slane %v1736_v41, %v3267_v19 }
 0x419   : > { %v1739_v44 = vpop.xlane.xlu0 %1738  ;;  %v1742_v46 = vpop.xlane.xlu1 %1741 }
 0x41a   : > { %v1778_v53 = vrot.slane %v1739_v44, %v3267_v19  ;;  %v1782_v57 = vrot.slane %v1742_v46, %v3267_v19 }
 0x41d   : > { %v1745_v52 = vpop.xlane.xlu0 %1744  ;;  %v1748_v56 = vpop.xlane.xlu1 %1747 }
 0x41e   : > { %v1786_v60 = vrot.slane %v1745_v52, %v3267_v19  ;;  %v1790_v62 = vrot.slane %v1748_v56, %v3267_v19  ;;  %v2638_v52 = vld [vmem:[%s3697_s12 + $0x8] sm:$0xf] }
 0x421   : > { %v1751_v61 = vpop.xlane.xlu0 %1750  ;;  %v1754_v3 = vpop.xlane.xlu1 %1753 }
 0x422   : > { %v1794_v4 = vrot.slane %v1751_v61, %v3267_v19  ;;  %v1798_v9 = vrot.slane %v1754_v3, %v3267_v19 }
 0x461   : > { %v1606_v30 = vpop.f32.mrb[8].mxu1 }
 0x462   : > { %v1612_v32 = vpack.c.bf16 %v1606_v30, %v1606_v30  ;;  %v2770_v33 = vpop.f32.mrb[9].mxu1 }
 0x463   : > { %v1609_v34 = vpop.f32.mrb[10].mxu1 }
 0x464   : > { %v2771_v36 = vpop.f32.mrb[11].mxu1  ;;  %2775 = vmatmul.mubr.msk.bf16.vlgmr.msra.gmra.mrb[20].mxu0 %vm1203_vm2, %v1612_v32 }
 0x465   : > { %2785 = vmatpush3.bf16.xpose.msra.mxu0 %v1811_v31  ;;  %2786 = vmatprep.mubr.msk.bf16.mxu0 %vm3027_vm0, %v3026_v1 }
 0x466   : > { %2796 = vmatprep.subr.bf16.mxu0 %v3026_v1 }
 0x46c   : > { %2787 = vmatmul.mubr.msk.bf16.vlgmr.msra.gmra.mrb[24].mxu0 %vm1203_vm2, %v3433_v51  ;;  %v1799_v51 = vsel %vm1270_vm4, %v1774_v48, %v1770_v54 }
 0x46d   : > { %2798 = vmatprep.mubr.msk.bf16.mxu0 %vm3027_vm0, %v3026_v1  ;;  %v1800_v59 = vsel %vm1272_vm5, %v1778_v53, %v1799_v51  ;;  %v1921_v53 = vsel %vm1346_vm3, %v2638_v52, 0 }
 0x46e   : > { %v1801_v63 = vsel %vm1274_vm6, %v1782_v57, %v1800_v59  ;;  %2797 = vmatpush3.bf16.msra.mxu0 %v1921_v53 }
 0x46f   : > { %v1802_v2 = vsel %vm1276_vm8, %v1786_v60, %v1801_v63  ;;  %2808 = vmatprep.subr.bf16.mxu0 %v3026_v1 }
 0x470   : > { %v1803_v10 = vsel %vm1278_vm9, %v1790_v62, %v1802_v2 }
 0x471   : > { %v1804_v11 = vsel %vm1280_vm10, %v1794_v4, %v1803_v10 }
 0x472   : > { %v1805_v12 = vsel %vm1282_vm11, %v1798_v9, %v1804_v11 }
 0x4d1   : > { %v1701_v37 = vpop.f32.mrb[12].mxu1 }
 0x4d2   : > { %v2782_v38 = vpop.f32.mrb[13].mxu1 }
 0x4d3   : > { %v1704_v39 = vpop.f32.mrb[14].mxu1 }
 0x4d4   : > { %v2783_v40 = vpop.f32.mrb[15].mxu1 }
 0x537   : > { %v1655_v0 = vpop.f32.mrb[20].mxu0 }
 0x538   : > { %v3484_v58 = vadd.f32 %v1701_v37, %v1655_v0  ;;  %v2776_v5 = vpop.f32.mrb[21].mxu0 }
 0x539   : > { %v1658_v6 = vpop.f32.mrb[22].mxu0 }
 0x53a   : > { %v2777_v8 = vpop.f32.mrb[23].mxu0 }
 0x53f   : > { %v1847_v14 = vpop.f32.mrb[24].mxu0 }
 0x540   : > { %v1848_v15 = vadd.f32 %v1847_v14, %v1805_v12  ;;  %v2788_v16 = vpop.f32.mrb[25].mxu0 }
 0x541   : > { %v1850_v18 = vpop.f32.mrb[26].mxu0 }
 0x542   : > { %v2789_v20 = vpop.f32.mrb[27].mxu0  ;;  %v1853_v21 = vadd.f32 %v1848_v15, %v3387_v55 }
 0x544   : > { %v1854_v23 = vsel %vm1203_vm2, %v1853_v21, -inf }
 0x545   : > { %1855 = vmax.xlane.f32.xlu0 %v1854_v23 }
 0x55b   : > { %1866 = vrot.lane.b32.xlu0 %v3291_v47, %s3031_s3 }
 0x55f   : > { %1964 = vrot.lane.b32.xlu0 %v3306_v17, %s3032_s23 }
 0x563   : > { %1968 = vrot.lane.b32.xlu0 %v3303_v13, %s3032_s23 }
 0x567   : > { %1972 = vrot.lane.b32.xlu0 %v3324_v45, %s3032_s23 }
 0x56b   : > { %1976 = vrot.lane.b32.xlu0 %v3321_v42, %s3032_s23 }
 0x5d2   : > { %v1856_v24 = vpop.xlane.xlu0 %1855 }
 0x5d3   : > { %v1857_v25 = vsub.f32 %v1853_v21, %v1856_v24 }
 0x5d5   : > { %v1858_v27 = vmul.f32 1.442695, %v1857_v25 }
 0x5d6   : > { %v1867_v28 = vpop.permute.xlu0 %1866 }
 0x5d7   : > { %2933 = vpow2.f32 %v1858_v27  ;;  %v1872_v29 = vsel %vm1346_vm3, %v1867_v28, 0 }
 0x5d8   : > { %2791 = vmatpush3.bf16.msra.mxu1 %v1872_v29 }
 0x5d9   : > { %2802 = vmatprep.subr.bf16.mxu1 %v3026_v1 }
 0x5da   : > { %v1965_v17 = vpop.permute.xlu0 %1964 }
 0x5db   : > { %v1988_v30 = vsel %vm1203_vm2, %v1965_v17, 0.0 }
 0x5dc   : > { %1989 = vadd.xlane.f32.xlu0 %v1988_v30 }
 0x5de   : > { %v1969_v13 = vpop.permute.xlu0 %1968 }
 0x5df   : > { %v1994_v45 = vsel %vm1203_vm2, %v1969_v13, 0.0 }
 0x5e0   : > { %1995 = vadd.xlane.f32.xlu0 %v1994_v45 }
 0x5e1   : > { %v2934_v31 = vpop.eup %2933 }
 0x5e2   : > { %v1860_v42 = vsel %vm1203_vm2, %v2934_v31, 0.0  ;;  %v1973_v36 = vpop.permute.xlu0 %1972 }
 0x5e3   : > { %1861 = vadd.xlane.f32.xlu1 %v1860_v42 }
 0x5e6   : > { %v1977_v40 = vpop.permute.xlu0 %1976 }
 0x5e7   : > { %v2006_v44 = vsel %vm1203_vm2, %v1977_v40, 0.0 }
 0x5f4   : > { %2014 = vrot.lane.b32.xlu1 %v3240_v7, %s3032_s23 }
 0x5f8   : > { %2012 = vrot.lane.b32.xlu1 %v3280_v35, %s3032_s23 }
 0x5fc   : > { %1966 = vrot.lane.b32.xlu1 %v3313_v26, %s3032_s23 }
 0x600   : > { %1970 = vrot.lane.b32.xlu1 %v3309_v22, %s3032_s23 }
 0x604   : > { %1974 = vrot.lane.b32.xlu1 %v3329_v50, %s3032_s23  ;;  %v2000_v50 = vsel %vm1203_vm2, %v1973_v36, 0.0 }
 0x608   : > { %1978 = vrot.lane.b32.xlu1 %v3327_v49, %s3032_s23 }
 0x669   : > { %v1990_v54 = vpop.xlane.xlu0 %1989 }
 0x66a   : > { %v2027_v60 = vrot.slane %v1990_v54, %v3267_v19 }
 0x66d   : > { %v1996_v56 = vpop.xlane.xlu0 %1995 }
 0x66e   : > { %v2035_v2 = vrot.slane %v1996_v56, %v3267_v19 }
 0x670   : > { %v1862_v32 = vpop.xlane.xlu1 %1861 }
 0x671   : > { %2935 = vrcp.f32 %v1862_v32 }
 0x674   : > { %v2015_v33 = vpop.permute.xlu1 %2014 }
 0x675   : > { %v2068_v26 = vsel %vm1203_vm2, %v2015_v33, 0 }
 0x678   : > { %v2013_v34 = vpop.permute.xlu1 %2012 }
 0x67b   : > { %v2936_v7 = vpop.eup %2935 }
 0x67c   : > { %v1864_v37 = vmul.f32 %v2936_v7, %v2934_v31  ;;  %v1967_v35 = vpop.permute.xlu1 %1966 }
 0x67d   : > { %v1991_v38 = vsel %vm1203_vm2, %v1967_v35, 0.0 }
 0x67e   : > { %1992 = vadd.xlane.f32.xlu1 %v1991_v38  ;;  %v1865_v22 = vpack.c.bf16 %v1864_v37, %v1864_v37 }
 0x680   : > { %v1971_v39 = vpop.permute.xlu1 %1970  ;;  %2793 = vmatmul.mubr.msk.bf16.vlgmr.msra.gmra.mrb[16].mxu1 %vm1203_vm2, %v1865_v22 }
 0x681   : > { %2803 = vmatpush3.bf16.xpose.msra.mxu1 %v2068_v26  ;;  %v1997_v49 = vsel %vm1203_vm2, %v1971_v39, 0.0  ;;  %2804 = vmatprep.mubr.msk.bf16.mxu1 %vm3027_vm0, %v3026_v1 }
 0x682   : > { %1998 = vadd.xlane.f32.xlu0 %v1997_v49  ;;  %2001 = vadd.xlane.f32.xlu1 %v2000_v50 }
 0x683   : > { %2814 = vmatprep.subr.bf16.mxu1 %v3026_v1 }
 0x684   : > { %v1975_v41 = vpop.permute.xlu1 %1974 }
 0x685   : > { %v2003_v43 = vsel %vm1203_vm2, %v1975_v41, 0.0 }
 0x686   : > { %2004 = vadd.xlane.f32.xlu0 %v2003_v43  ;;  %2007 = vadd.xlane.f32.xlu1 %v2006_v44 }
 0x688   : > { %v1979_v46 = vpop.permute.xlu1 %1978  ;;  %2805 = vmatmul.mubr.msk.bf16.vlgmr.msra.gmra.mrb[20].mxu1 %vm1203_vm2, %v2013_v34 }
 0x689   : > { %v2009_v48 = vsel %vm1203_vm2, %v1979_v46, 0.0  ;;  %2816 = vmatprep.mubr.msk.bf16.mxu1 %vm3027_vm0, %v3026_v1  ;;  %v2644_v46 = vld [vmem:[%s3698_s13] ss:$0 sm:$0xff] }
 0x68a   : > { %2010 = vadd.xlane.f32.xlu0 %v2009_v48 }
 0x70b   : > { %v1993_v51 = vpop.xlane.xlu1 %1992 }
 0x70c   : > { %v2031_v59 = vrot.slane %v1993_v51, %v3267_v19 }
 0x70e   : > { %v2056_v63 = vsel %vm1270_vm4, %v2031_v59, %v2027_v60  ;;  %v2945_v59 = vld [vmem:[%s3229_s4] sm:$0xff] }
 0x70f   : > { %v1999_v57 = vpop.xlane.xlu0 %1998  ;;  %v2002_v61 = vpop.xlane.xlu1 %2001  ;;  %v2057_v4 = vsel %vm1272_vm5, %v2035_v2, %v2056_v63 }
 0x710   : > { %v2039_v0 = vrot.slane %v1999_v57, %v3267_v19  ;;  %v2043_v3 = vrot.slane %v2002_v61, %v3267_v19 }
 0x712   : > { %v2058_v5 = vsel %vm1274_vm6, %v2039_v0, %v2057_v4  ;;  %v2917_v4 = vld [vmem:[%s3701_s16] sm:$0xff]  }
 0x713   : > { %v2005_v62 = vpop.xlane.xlu0 %2004  ;;  %v2008_v6 = vpop.xlane.xlu1 %2007  ;;  %v2059_v16 = vsel %vm1276_vm8, %v2043_v3, %v2058_v5  ;;  %v2918_v5 = vld [vmem:[%s3701_s16 + $0x8] sm:$0xff]  }
 0x714   : > { %v2047_v8 = vrot.slane %v2005_v62, %v3267_v19  ;;  %v2051_v15 = vrot.slane %v2008_v6, %v3267_v19  ;;  %v2919_v6 = vld [vmem:[%s3703_s18] sm:$0xff]  }
 0x716   : > { %v2060_v20 = vsel %vm1278_vm9, %v2047_v8, %v2059_v16  ;;  %v2920_v8 = vld [vmem:[%s3703_s18 + $0x8] sm:$0xff]   ;;  %v2645_v16 = vld [vmem:[%s3699_s14] ss:$0 sm:$0xff] }
 0x717   : > { %v2011_v10 = vpop.xlane.xlu0 %2010  ;;  %v2061_v23 = vsel %vm1280_vm10, %v2051_v15, %v2060_v20  ;;  %v2646_v20 = vld [vmem:[%s3700_s15] ss:$0 sm:$0xff] }
 0x718   : > { %v2055_v21 = vrot.slane %v2011_v10, %v3267_v19  ;;  %v2922_v10 = vld [vmem:[%s3703_s18 + $0x18] sm:$0xff]  }
 0x71a   : > { %v2062_v24 = vsel %vm1282_vm11, %v2055_v21, %v2061_v23 }
 0x753   : > { %v1908_v9 = vpop.f32.mrb[16].mxu1 }
 0x754   : > { %v1914_v11 = vpack.c.bf16 %v1908_v9, %v1908_v9  ;;  %v2794_v12 = vpop.f32.mrb[17].mxu1  ;;  %v2921_v9 = vld [vmem:[%s3703_s18 + $0x10] sm:$0xff]  }
 0x755   : > { %v1911_v14 = vpop.f32.mrb[18].mxu1 }
 0x756   : > { %v2795_v18 = vpop.f32.mrb[19].mxu1  ;;  %2799 = vmatmul.mubr.msk.bf16.vlgmr.msra.gmra.mrb[28].mxu0 %vm1203_vm2, %v1914_v11 }
 0x757   : > { %2810 = vmatprep.mubr.msk.bf16.mxu0 %vm3027_vm0, %v3026_v1 }
 0x75b   : > { %v2104_v25 = vpop.f32.mrb[20].mxu1 }
 0x75c   : > { %v2105_v27 = vadd.f32 %v2104_v25, %v2062_v24  ;;  %v2806_v28 = vpop.f32.mrb[21].mxu1  ;;  %v2923_v25 = vld [vmem:[%s3703_s18 + $0x20] sm:$0xff]  }
 0x75d   : > { %v2107_v29 = vpop.f32.mrb[22].mxu1  ;;  %v2647_v28 = vld [vmem:[%s3702_s17] ss:$0 sm:$0xff] }
 0x75e   : > { %v2807_v17 = vpop.f32.mrb[23].mxu1  ;;  %v2110_v30 = vadd.f32 %v2105_v27, %v3387_v55  ;;  %v2642_v55 = vld [vmem:[%s3697_s12 + $0xc] sm:$0xf] }
 0x75f   : > { %v2924_v27 = vld [vmem:[%s3703_s18 + $0x28] sm:$0xff]  }
 0x760   : > { %v2111_v13 = vsel %vm1203_vm2, %v2110_v30, -inf }
 0x761   : > { %2112 = vmax.xlane.f32.xlu1 %v2111_v13 }
 0x772   : > { %2123 = vrot.lane.b32.xlu1 %v3291_v47, %s3032_s23  ;;  %v2178_v47 = vsel %vm1346_vm3, %v2642_v55, 0  ;;  %s2594_s23 = sshll.u32 %s744_s27, 3 }
 0x773   : > { %2815 = vmatpush3.bf16.msra.mxu1 %v2178_v47  ;;  %s746_s24 = scalar_lea.vmem [#allocation2], %s2594_s23  ;;  %s2950_s23 = sshll.u32 %s3033_s30, 4  ;;  %s2951_s23 = int_to_ptr.vmem [resolvable:$false] %s2950_s23 }
 0x774   : > { %2828 = vmatprep.subr.bf16.mxu1 %v3026_v1  ;;  %s2479_s3 = sshll.u32 %s746_s24, 4  ;;  %s3639_s3 = int_to_ptr.vmem [resolvable:$true] %s2479_s3 }
 0x775   : > { %s2946_s20 = scalar_lea.vmem %s3639_s3, 128  ;;  %p2953_p1 = scmp.lt.s32.totalorder %s3639_s3, %s2951_s23 }
 0x776   : > { %p2947_p12 = scmp.ne.s32.totalorder %s3639_s3, %s2946_s20 }
 0x778   : > { %p2948_p13 = pnand %p2947_p12, %p3189_p4 }
 0x77a   : > { %p2949_p0 = pneg %p2948_p13 }
 0x7ee   : > { %v2113_v19 = vpop.xlane.xlu1 %2112 }
 0x7ef   : > { %v2114_v45 = vsub.f32 %v2110_v30, %v2113_v19 }
 0x7f1   : > { %v2115_v31 = vmul.f32 1.442695, %v2114_v45 }
 0x7f2   : > { %v2124_v42 = vpop.permute.xlu1 %2123 }
 0x7f3   : > { %2937 = vpow2.f32 %v2115_v31  ;;  %v2129_v32 = vsel %vm1346_vm3, %v2124_v42, 0 }
 0x7f4   : > { %2809 = vmatpush3.bf16.msra.mxu0 %v2129_v32 }
 0x7f5   : > { %2820 = vmatprep.subr.bf16.mxu0 %v3026_v1 }
 0x7fd   : > { %v2938_v33 = vpop.eup %2937 }
 0x7fe   : > { %v2117_v34 = vsel %vm1203_vm2, %v2938_v33, 0.0 }
 0x7ff   : > { %2118 = vadd.xlane.f32.xlu0 %v2117_v34 }
 0x829   : > { %v1957_v7 = vpop.f32.mrb[28].mxu0 }
 0x82a   : > { %v1963_v36 = vadd.f32 %v1957_v7, %v3484_v58  ;;  %v2800_v37 = vpop.f32.mrb[29].mxu0 }
 0x82b   : > { %v1960_v35 = vpop.f32.mrb[30].mxu0 }
 0x82c   : > { %v2801_v38 = vpop.f32.mrb[31].mxu0 }
 0x88c   : > { %v2119_v26 = vpop.xlane.xlu0 %2118 }
 0x88d   : > { %2939 = vrcp.f32 %v2119_v26 }
 0x897   : > { %v2940_v22 = vpop.eup %2939 }
 0x898   : > { %v2121_v39 = vmul.f32 %v2940_v22, %v2938_v33 }
 0x89a   : > { %v2122_v49 = vpack.c.bf16 %v2121_v39, %v2121_v39 }
 0x89c   : > { %2811 = vmatmul.mubr.msk.bf16.vlgmr.msra.gmra.mrb[32].mxu0 %vm1203_vm2, %v2122_v49 }
 0x89d   : > { %2824 = vmatprep.mubr.msk.bf16.mxu0 %vm3027_vm0, %v3026_v1  ;;  %2821 = vmatpush3.bf16.msra.mxu0 %v2917_v4 }
 0x89e   : > { %2822 = vmatprep.subr.bf16.mxu0 %v3026_v1 }
 0x8a1   : > { %2823 = vmatpush3.bf16.msra.mxu0 %v2918_v5 }
 0x96f   : > { %v2165_v50 = vpop.f32.mrb[32].mxu0 }
 0x970   : > { %v2171_v40 = vpack.c.bf16 %v2165_v50, %v2165_v50  ;;  %v2812_v41 = vpop.f32.mrb[33].mxu0 }
 0x971   : > { %v2168_v43 = vpop.f32.mrb[34].mxu0  ;;  %v2659_v41 = vld [vmem:[%s3749_s21] ss:$0 sm:$0xff]  ;;  %s2952_s21 = scalar_lea.vmem %s2951_s23, 256 }
 0x972   : > { %v2813_v44 = vpop.f32.mrb[35].mxu0  ;;  %2817 = vmatmul.mubr.msk.bf16.vlgmr.msra.gmra.mrb[24].mxu1 %vm1203_vm2, %v2171_v40  ;;  %p2954_p2 = scmp.lt.s32.totalorder %s2952_s21, %s2946_s20 }
 0x973   : > { %2840 = vmatprep.mubr.msk.bf16.mxu1 %vm3027_vm0, %v3026_v1  ;;  %2829 = vmatpush3.bf16.msra.mxu1 %v2919_v6  ;;  %v2660_v44 = vld [vmem:[%s3750_s6] ss:$0 sm:$0xff] }
 0x974   : > { %2830 = vmatprep.subr.bf16.mxu1 %v3026_v1  ;;  %p2955_p3 = por %p2954_p2, %p2953_p1 }
 0x976   : > { %p2956_p5 = pnand %p2955_p3, %p2949_p0 }
 0x977   : > { %2831 = vmatpush3.bf16.msra.mxu1 %v2920_v8 }
 0x978   : > { %2832 = vmatprep.subr.bf16.mxu1 %v3026_v1 }
 0x97b   : > { %2833 = vmatpush3.bf16.msra.mxu1 %v2921_v9 }
 0x97c   : > { %2834 = vmatprep.subr.bf16.mxu1 %v3026_v1 }
 0x97f   : > { %2835 = vmatpush3.bf16.msra.mxu1 %v2922_v10 }
 0x980   : > { %2836 = vmatprep.subr.bf16.mxu1 %v3026_v1 }
 0x983   : > { %2837 = vmatpush3.bf16.msra.mxu1 %v2923_v25 }
 0x984   : > { %2838 = vmatprep.subr.bf16.mxu1 %v3026_v1  ;;  %v2651_v1 = vld [vmem:[%s3704_s19] ss:$0 sm:$0xff] }
 0x987   : > { %2839 = vmatpush3.bf16.msra.mxu1 %v2924_v27 }
 0xa45   : > { %v2214_v58 = vpop.f32.mrb[24].mxu1 }
 0xa46   : > { %v2220_v48 = vadd.f32 %v2214_v58, %v1963_v36  ;;  %v2818_v52 = vpop.f32.mrb[25].mxu1 }
 0xa47   : > { %v2217_v53 = vpop.f32.mrb[26].mxu1 }
 0xa48   : > { %v2228_v54 = vadd.f32 %v2644_v46, %v2220_v48  ;;  %v2819_v56 = vpop.f32.mrb[27].mxu1 }
 0xa4a   : > { %v2230_v51 = vmul.f32 0.01, %v2228_v54  ;;  %vm2229_vm12 = vcmp.ge.f32.partialorder %v2228_v54, 0.0 }
 0xa4c   : > { %v2231_v57 = vsel %vm2229_vm12, %v2228_v54, %v2230_v51 }
 0xa4d   : > { %v2232_v60 = vadd.f32 %v2945_v59, %v2231_v57 }
 0xa4f   : > { %v2235_v61 = vsel %vm806_vm1, %v2232_v60, 0.0 }
 0xa50   : > { %2236 = vadd.xlane.f32.xlu0 %v2235_v61 }
 0xadd   : > { %v2237_v62 = vpop.xlane.xlu0 %2236 }
 0xade   : > { %v2239_v63 = vmul.f32 0.03125, %v2237_v62 }
 0xae0   : > { %v2240_v0 = vsub.f32 %v2232_v60, %v2239_v63 }
 0xae2   : > { %v2241_v2 = vmul.f32 %v2240_v0, %v2240_v0 }
 0xae4   : > { %v2242_v3 = vsel %vm806_vm1, %v2241_v2, 0.0 }
 0xae5   : > { %2243 = vadd.xlane.f32.xlu0 %v2242_v3 }
 0xb72   : > { %v2244_v11 = vpop.xlane.xlu0 %2243 }
 0xb73   : > { %v2245_v12 = vmul.f32 0.03125, %v2244_v11 }
 0xb75   : > { %v2246_v14 = vadd.f32 1e-05, %v2245_v12 }
 0xb77   : > { %2941 = vrsqrt.f32 %v2246_v14 }
 0xb81   : > { %v2942_v15 = vpop.eup %2941 }
 0xb82   : > { %v2248_v18 = vmul.f32 %v2942_v15, %v2240_v0 }
 0xb84   : > { %v2255_v21 = vmul.f32 %v2645_v16, %v2248_v18 }
 0xb86   : > { %v2262_v23 = vadd.f32 %v2646_v20, %v2255_v21 }
 0xb88   : > { %v2263_v24 = vpack.c.bf16 %v2262_v23, %v2262_v23 }
 0xb8a   : > { %2825 = vmatmul.mubr.msk.bf16.vlgmr.msra.gmra.mrb[36].mxu0 %vm806_vm1, %v2263_v24 }
 0xc5d   : > { %v2324_v29 = vpop.f32.mrb[36].mxu0 }
 0xc5e   : > { %v2325_v17 = vadd.f32 %v2647_v28, %v2324_v29  ;;  %v2826_v30 = vpop.f32.mrb[37].mxu0 }
 0xc5f   : > { %v2327_v13 = vpop.f32.mrb[38].mxu0 }
 0xc60   : > { %vm2330_vm13 = vcmp.ge.f32.partialorder %v2325_v17, 0.0  ;;  %v2331_v19 = vmul.f32 0.01, %v2325_v17  ;;  %v2827_v45 = vpop.f32.mrb[39].mxu0 }
 0xc62   : > { %v2332_v31 = vsel %vm2330_vm13, %v2325_v17, %v2331_v19 }
 0xc63   : > { %v2333_v42 = vpack.c.bf16 %v2332_v31, %v2332_v31 }
 0xc65   : > { %2841 = vmatmul.mubr.msk.bf16.vlgmr.msra.gmra.mrb[28].mxu1 %vm2389_vm14, %v2333_v42 }
 0xd38   : > { %v2427_v32 = vpop.f32.mrb[28].mxu1 }
 0xd39   : > { %v2428_v33 = vadd.f32 %v2651_v1, %v2427_v32  ;;  %v2842_v34 = vpop.f32.mrb[29].mxu1 }
 0xd3a   : > { %v2430_v55 = vpop.f32.mrb[30].mxu1 }
 0xd3b   : > { %v2843_v47 = vpop.f32.mrb[31].mxu1  ;;  %v2433_v7 = vadd.f32 %v2428_v33, %v2262_v23 }
 0xd3d   : > { %v2436_v36 = vsel %vm806_vm1, %v2433_v7, 0.0 }
 0xd3e   : > { %2437 = vadd.xlane.f32.xlu0 %v2436_v36 }
 0xdcb   : > { %v2438_v37 = vpop.xlane.xlu0 %2437 }
 0xdcc   : > { %v2439_v35 = vmul.f32 0.03125, %v2438_v37 }
 0xdce   : > { %v2440_v38 = vsub.f32 %v2433_v7, %v2439_v35 }
 0xdd0   : > { %v2441_v26 = vmul.f32 %v2440_v38, %v2440_v38 }
 0xdd2   : > { %v2442_v22 = vsel %vm806_vm1, %v2441_v26, 0.0 }
 0xdd3   : > { %2443 = vadd.xlane.f32.xlu0 %v2442_v22 }
 0xe60   : > { %v2444_v39 = vpop.xlane.xlu0 %2443 }
 0xe61   : > { %v2445_v49 = vmul.f32 0.03125, %v2444_v39 }
 0xe63   : > { %v2446_v50 = vadd.f32 1e-05, %v2445_v49 }
 0xe65   : > { %2943 = vrsqrt.f32 %v2446_v50 }
 0xe6f   : > { %v2944_v40 = vpop.eup %2943 }
 0xe70   : > { %v2448_v43 = vmul.f32 %v2944_v40, %v2440_v38 }
 0xe72   : > { %v2455_v58 = vmul.f32 %v2659_v41, %v2448_v43 }
 0xe74   : > { %v2462_v46 = vadd.f32 %v2660_v44, %v2455_v58 }
 0xe76   : > { %2463 = vst.msk [vmem:[%s746_s24] sm:$0xff] %vm806_vm1, %v2462_v46 }
 0xe77   : > { %2959 = shalt.err (!%p2956_p5)
}
 0xe78   : > { %s2960_s27 = scalar_lea.hbm %s3637_s25, 128  ;;  %s2964_s6 = scalar_lea.hbm %s3751_s1, 256 }
 0xe79   : > { %p2961_p6 = scmp.ne.s32.totalorder %s3637_s25, %s2960_s27  ;;  %p2965_p10 = scmp.lt.u32.totalorder %s3637_s25, %s3751_s1 }
 0xe7a   : > { %p2966_p11 = scmp.lt.u32.totalorder %s2964_s6, %s2960_s27  ;;  %p2968_p13 = scmp.lt.u32.totalorder %s2960_s27, %s3637_s25 }
 0xe7b   : > { %p2962_p7 = pnand %p2961_p6, %p3189_p4 }
 0xe7c   : > { %p2967_p12 = por %p2966_p11, %p2965_p10 }
 0xe7d   : > { %p2963_p9 = pneg %p2962_p7 }
 0xe7e   : > { %p2969_p0 = por %p2968_p13, %p2967_p12 }
 0xe80   : > { %p2970_p1 = pnand %p2969_p0, %p2963_p9 }
 0xe82   : > { %2973 = shalt.err (!%p2970_p1)
}
 0xe83   : > { %2844 = dma.vmem_to_hbm [thread:$0]  (%p3189_p4), %s3639_s3, 128, %s3637_s25, %s2465_s29  }
 0xe84 PF: > { %s3752_s4 = sld [smem:[#allocation8_spill]]  ;;  %s3753_s22 = sld [smem:[#allocation5_spill]] }
 0xe8a   : > { %p2850_p2 = scmp.ge.s32.totalorder %s3752_s4, 2  ;;  %s2491_s30 = sand.u32 1, %s3753_s22  }
 0xe8b   : > { %s2492_s23 = scalar_lea.sflag [#allocation3], %s2491_s30 }
 0xe8c   : > { %p2847_p3 = pnand %p2850_p2, %p3196_p8 }
 0xe8e   : > { %2999 = dma.done.wait (!%p2847_p3), %s2492_s23, 128  }
 0xe8f   : > { %3001 = vsyncadd (!%p2847_p3), %s2492_s23, 4294967168  ;;  %s35_s0 = sadd.s32 1, %s3752_s4   ;;  %s3755_s21 = sld [smem:[#allocation6_spill]] }
 0xe90   : > { %p32_p5 = scmp.ge.s32.totalorder %s35_s0, 4   ;;  %s3756_s29 = sld [smem:[#allocation12_spill]] }
 0xe91   : > { %s3757_s30 = sld [smem:[#allocation7_spill]]  ;;  %s3758_s4 = sld [smem:[#allocation9_spill]] }
 0xe92   : > { %s3759_s3 = smov %s3008_s28  ;;  %34 = sbr.rel (!%p32_p5) target bundleno = 15 (0xf), region = 155 }
 0xe95   : > { %s3760_s28 = smov %s3755_s21 }
 0xe99   :  { %2497 = vsyncpa [#allocation3], 1 }
 0xe9a   :  { %2499 = vsyncpa [#allocation3 + $0x1], 1 }

</bundles_post_ra>
